<compile_context>
chip_gen: v7x
topology: tpu7x:2x2x1
jax: 0.10.0
libtpu: 0.0.40
codegen_flags: <defaults>
</compile_context>

<pallas_src>
import functools

import jax
import jax.numpy as jnp
from jax.experimental import pallas as pl
from jax.experimental.pallas import tpu as pltpu

F32 = jnp.float32
MXU_DTYPE = jnp.bfloat16  # matmul operand dtype; accumulation is always f32


def _round_up(x, m):
    return (x + m - 1) // m * m


def _vmem_limit_bytes(L, D, H, K):
    """Generous per-step VMEM estimate (double-buffered I/O + resident weights
    + scratch + spill headroom), clamped to a range that is safe on all of
    v5e / v6e / v7x."""
    pad0 = _round_up(max(K - 1, 1), 8)
    blk = L * D * 4                                    # one f32 [L, D] block
    io = 2 * 2 * blk                                   # x in + out, double-buffered
    weights = 2 * 2 * (2 * D * D + D * D + 2 * H * K * D)   # bf16, worst-case 2 bufs
    small = 2 * 4 * (2 * D + 2 * H * K + H * K + 2 * D)
    scratch = (pad0 + L) * D * 4 + L * D * 2
    headroom = 4 * blk + (4 << 20)                     # [L,2D] sig spills etc.
    total = io + weights + small + scratch + headroom
    return int(min(max(total, 32 << 20), 64 << 20))


# ----------------------------------------------------------------------------
# fused kernel: GLU -> block-diag energies -> banded softmax/MAC -> fc ->
#               residual -> LayerNorm     (grid over batch, weights resident)
# ----------------------------------------------------------------------------
def _make_kernel(L, D, H, K, mxu_dtype):
    dc = D // H
    pad0 = _round_up(max(K - 1, 1), 8)   # 8-aligned zero-pad rows
    base = pad0 - (K - 1)                # row offset of the j=0 shifted window
    n_off_band = L - 1                   # -10000 columns per row of the torch
                                         # expanded matrix (denominator only)

    def kern(x_ref, gw_ref, gb_ref, ew_ref, eb_ref, stt_ref, fcw_ref,
             lng_ref, lnb_ref, o_ref, pad_ref, conv_ref):
        xm = x_ref[0]                                        # [L, D] f32 (residual)
        xc = xm.astype(mxu_dtype)

        # ---- GLU: one [L, D] @ [D, 2D] matmul, slice the a / b halves -------
        sig = jnp.dot(xc, gw_ref[...], preferred_element_type=F32) + gb_ref[...]
        g = sig[:, :D] * jax.nn.sigmoid(sig[:, D:])          # [L, D] f32

        # ---- predict_energy for all heads at once (block-diagonal weight) ---
        e_all = (jnp.dot(g.astype(mxu_dtype), ew_ref[...],
                         preferred_element_type=F32) + eb_ref[...])  # [L, 2HK]

        # ---- 8-aligned zero-padded full-width copy of g for the shifted MACs
        pad_ref[0:pad0, :] = jnp.zeros((pad0, D), F32)       # aligned, tiny
        pad_ref[pad0:, :] = g                                 # aligned [L, D] store

        stt_all = stt_ref[...]                               # [H, K]
        for h in range(H):
            off = 2 * K * h
            dyn = e_all[:, off:off + K]
            gate = e_all[:, off + K:off + 2 * K]
            energy = jax.nn.sigmoid(gate) * dyn + stt_all[h:h + 1, :]   # [L, K]

            # softmax over the K-wide band; the (L-1) out-of-band -10000
            # columns of torch's expanded matrix only enter the denominator
            # (they underflow to 0 exactly like the reference).
            m = jnp.maximum(jnp.max(energy, axis=-1, keepdims=True), -10000.0)
            e = jnp.exp(energy - m)
            denom = (jnp.sum(e, axis=-1, keepdims=True)
                     + n_off_band * jnp.exp(-10000.0 - m))
            p = e * pl.reciprocal(denom, approx=True)        # [L, K]

            # banded mat-vec as K shifted multiply-accumulates:
            #   out[i] = sum_j p[i, j] * g[i + j - (K-1), h*dc:(h+1)*dc]
            # (rows with i + j < K-1 read the zero pad, matching the weights
            #  torch drops with its [:, :, K-1:] slice)
            acc = jnp.zeros((L, dc), F32)
            for j in range(K):
                acc = acc + p[:, j:j + 1] * pad_ref[base + j:base + j + L,
                                                    h * dc:(h + 1) * dc]
            conv_ref[:, h * dc:(h + 1) * dc] = acc.astype(conv_ref.dtype)

        # ---- bias-free fc as ONE dense matmul + residual + LayerNorm --------
        v = jnp.dot(conv_ref[...], fcw_ref[...],
                    preferred_element_type=F32) + xm
        mu = jnp.mean(v, axis=-1, keepdims=True)
        var = jnp.mean((v - mu) ** 2, axis=-1, keepdims=True)
        y = (v - mu) * jax.lax.rsqrt(var + 1e-6) * lng_ref[...] + lnb_ref[...]
        o_ref[0] = y.astype(o_ref.dtype)

    return kern, pad0


# ----------------------------------------------------------------------------
# module forward (eval mode) — wrapper only builds operands; all math is in
# the single fused kernel above
# ----------------------------------------------------------------------------
def fast_self_attention_dec(x, params, n_head, kernel_size,
                            mxu_dtype=MXU_DTYPE):
    """FastSelfAttentionDec.forward, eval mode (dropouts = identity).

    x: [B, L, d_model] f32.  Assumes d_conv == d_model // n_head, as required
    by the reshape inside the torch module.
    """
    B, L, D = x.shape
    H, K = n_head, kernel_size

    glu_w = params["glu_w"].astype(mxu_dtype)                 # [D, 2D]
    glu_b = params["glu_b"].astype(F32)                       # [1, 2D]

    # block-diagonal predict_energy weight: head h occupies rows h*dc:(h+1)*dc
    # and columns h*2K:(h+1)*2K (first K = dyn, last K = gate).
    ew = jnp.kron(jnp.eye(H, dtype=F32),
                  params["pe_w"].astype(F32)).astype(mxu_dtype)   # [D, 2HK]
    eb = jnp.tile(params["pe_b"].astype(F32), (1, H))         # [1, 2HK]

    stt = params["stt"].reshape(H, K).astype(F32)             # [H, K]
    fc_w = params["fc_w"].astype(mxu_dtype)                   # [D, D]
    ln_g = params["ln_g"].astype(F32)
    ln_b = params["ln_b"].astype(F32)

    kern, pad0 = _make_kernel(L, D, H, K, mxu_dtype)

    return pl.pallas_call(
        kern,
        out_shape=jax.ShapeDtypeStruct((B, L, D), F32),
        grid=(B,),
        in_specs=[
            pl.BlockSpec((1, L, D), lambda b: (b, 0, 0)),         # x (residual)
            pl.BlockSpec((D, 2 * D), lambda b: (0, 0)),           # glu weight
            pl.BlockSpec((1, 2 * D), lambda b: (0, 0)),           # glu bias
            pl.BlockSpec((D, 2 * H * K), lambda b: (0, 0)),       # energy W (blockdiag)
            pl.BlockSpec((1, 2 * H * K), lambda b: (0, 0)),       # energy bias
            pl.BlockSpec((H, K), lambda b: (0, 0)),               # stt_energy
            pl.BlockSpec((D, D), lambda b: (0, 0)),               # fc weight
            pl.BlockSpec((1, D), lambda b: (0, 0)),               # layer_norm gamma
            pl.BlockSpec((1, D), lambda b: (0, 0)),               # layer_norm beta
        ],
        out_specs=pl.BlockSpec((1, L, D), lambda b: (b, 0, 0)),
        scratch_shapes=[
            pltpu.VMEM((pad0 + L, D), F32),       # zero-padded shifted-g buffer
            pltpu.VMEM((L, D), mxu_dtype),        # per-head conv results (fc LHS)
        ],
        compiler_params=pltpu.CompilerParams(
            dimension_semantics=("parallel",),
            vmem_limit_bytes=_vmem_limit_bytes(L, D, H, K)),
    )(x, glu_w, glu_b, ew, eb, stt, fc_w, ln_g, ln_b)


# ----------------------------------------------------------------------------
# pure-JAX reference (faithful transcription of the torch module, f32)
# ----------------------------------------------------------------------------
def ref_forward(x, p, n_head, kernel_size):
    B, L, D = x.shape
    H, K = n_head, kernel_size
    dc = D // H
    W = L + K - 1

    sig = x @ p["glu_w"] + p["glu_b"]
    g = sig[..., :D] * jax.nn.sigmoid(sig[..., D:])

    ci = g.reshape(B, L, H, dc).transpose(0, 2, 1, 3).reshape(B * H, L, dc)
    ctrl = ci @ p["pe_w"] + p["pe_b"]
    dyn = jax.nn.sigmoid(ctrl[..., K:]) * ctrl[..., :K]
    stt = jnp.broadcast_to(p["stt"], (B, H, 1, K)).reshape(B * H, 1, K)
    energy = dyn + stt                                        # [BH, L, K]

    # expanded[b, i, i + j] = energy[b, i, j]; fill = -10000 (as_strided trick)
    rows = jnp.arange(L)[:, None]
    cols = jnp.arange(W)[None, :]
    j_idx = cols - rows
    in_band = (j_idx >= 0) & (j_idx < K)
    j_clip = jnp.clip(j_idx, 0, K - 1)
    gathered = jnp.take_along_axis(
        energy, jnp.broadcast_to(j_clip[None], (B * H, L, W)), axis=2)
    expanded = jnp.where(in_band[None], gathered, -10000.0)
    attn = jax.nn.softmax(expanded, axis=2)[:, :, K - 1:]     # [BH, L, L]
    conv = attn @ ci
    conv = conv.reshape(B, H, L, dc).transpose(0, 2, 1, 3).reshape(B, L, D)

    v = conv @ p["fc_w"] + x
    mu = v.mean(-1, keepdims=True)
    var = ((v - mu) ** 2).mean(-1, keepdims=True)
    return (v - mu) * jax.lax.rsqrt(var + 1e-6) * p["ln_g"] + p["ln_b"]


# ----------------------------------------------------------------------------
# deterministic synthetic parameters (shapes per module __init__)
# ----------------------------------------------------------------------------
def init_params(key, d_model, n_head, kernel_size):
    d_conv = d_model // n_head
    ks = jax.random.split(key, 8)
    return {
        "glu_w": jax.random.normal(ks[0], (d_model, 2 * d_model), F32) * 0.1,
        "glu_b": jax.random.normal(ks[1], (1, 2 * d_model), F32) * 0.05,
        "fc_w": jax.random.normal(ks[2], (d_model, d_model), F32) * 0.1,
        "pe_w": jax.random.normal(ks[3], (d_conv, 2 * kernel_size), F32) * 0.1,
        "pe_b": jax.random.normal(ks[4], (1, 2 * kernel_size), F32) * 0.05,
        # torch init is ones / ones / zeros; perturb so the check is non-trivial
        "stt": 1.0 + 0.1 * jax.random.normal(
            ks[5], (1, n_head, 1, kernel_size), F32),
        "ln_g": 1.0 + 0.1 * jax.random.normal(ks[6], (1, d_model), F32),
        "ln_b": 0.05 * jax.random.normal(ks[7], (1, d_model), F32),
    }


# ----------------------------------------------------------------------------
if __name__ == "__main__":
    B, L = 2, 16
    d_model, n_head, kernel_size = 32, 4, 15

    key = jax.random.PRNGKey(0)
    kx, kp = jax.random.split(key)
    x = jax.random.normal(kx, (B, L, d_model), F32)
    params = init_params(kp, d_model, n_head, kernel_size)

    fwd = jax.jit(functools.partial(fast_self_attention_dec,
                                    n_head=n_head, kernel_size=kernel_size))
    out = fwd(x, params)
    jax.block_until_ready(out)

    ref = ref_forward(x, params, n_head, kernel_size)
    assert out.shape == (B, L, d_model)
    assert bool(jnp.all(jnp.isfinite(out)))
    # bf16 MXU operands + approx reciprocal -> loose-but-meaningful tolerance
    assert bool(jnp.allclose(out, ref, atol=3e-2, rtol=3e-2)), \
        float(jnp.max(jnp.abs(out - ref)))
    print("KERNEL_OK")
</pallas_src>

<mosaic_0001>
module attributes {stable_mosaic.version = 11 : i64} {
  func.func @kern(%arg0: i32, %arg1: memref<1x16x32xf32, #tpu.memory_space<vmem>>, %arg2: memref<32x64xbf16, #tpu.memory_space<vmem>>, %arg3: memref<1x64xf32, #tpu.memory_space<vmem>>, %arg4: memref<32x120xbf16, #tpu.memory_space<vmem>>, %arg5: memref<1x120xf32, #tpu.memory_space<vmem>>, %arg6: memref<4x15xf32, #tpu.memory_space<vmem>>, %arg7: memref<32x32xbf16, #tpu.memory_space<vmem>>, %arg8: memref<1x32xf32, #tpu.memory_space<vmem>>, %arg9: memref<1x32xf32, #tpu.memory_space<vmem>>, %arg10: memref<1x16x32xf32, #tpu.memory_space<vmem>>, %arg11: memref<32x32xf32, #tpu.memory_space<vmem>>, %arg12: memref<16x32xbf16, #tpu.memory_space<vmem>>) attributes {dimension_semantics = [#tpu.dimension_semantics<parallel>], iteration_bounds = array<i64: 2>, scalar_prefetch = 0 : i64, scratch_operands = 2 : i64, tpu.core_type = #tpu.core_type<tc>, window_params = [{transform_indices = @transform_0, window_bounds = array<i64: 1, 16, 32>}, {pipeline_mode = #tpu.pipeline_mode<synchronous>, transform_indices = @transform_1, window_bounds = array<i64: 32, 64>}, {pipeline_mode = #tpu.pipeline_mode<synchronous>, transform_indices = @transform_2, window_bounds = array<i64: 1, 64>}, {pipeline_mode = #tpu.pipeline_mode<synchronous>, transform_indices = @transform_3, window_bounds = array<i64: 32, 120>}, {pipeline_mode = #tpu.pipeline_mode<synchronous>, transform_indices = @transform_4, window_bounds = array<i64: 1, 120>}, {pipeline_mode = #tpu.pipeline_mode<synchronous>, transform_indices = @transform_5, window_bounds = array<i64: 4, 15>}, {pipeline_mode = #tpu.pipeline_mode<synchronous>, transform_indices = @transform_6, window_bounds = array<i64: 32, 32>}, {pipeline_mode = #tpu.pipeline_mode<synchronous>, transform_indices = @transform_7, window_bounds = array<i64: 1, 32>}, {pipeline_mode = #tpu.pipeline_mode<synchronous>, transform_indices = @transform_8, window_bounds = array<i64: 1, 32>}, {transform_indices = @transform_9, window_bounds = array<i64: 1, 16, 32>}]} {
    %c0 = arith.constant 0 : index
    %c0_0 = arith.constant 0 : index
    %c0_1 = arith.constant 0 : index
    %0 = vector.load %arg1[%c0, %c0_0, %c0_1] : memref<1x16x32xf32, #tpu.memory_space<vmem>>, vector<1x16x32xf32>
    %1 = vector.shape_cast %0 : vector<1x16x32xf32> to vector<16x32xf32>
    %2 = arith.truncf %1 : vector<16x32xf32> to vector<16x32xbf16>
    %c0_2 = arith.constant 0 : index
    %c0_3 = arith.constant 0 : index
    %3 = vector.load %arg2[%c0_2, %c0_3] : memref<32x64xbf16, #tpu.memory_space<vmem>>, vector<32x64xbf16>
    %cst = arith.constant dense<0.000000e+00> : vector<16x64xf32>
    %4 = tpu.matmul %2, %3, %cst {dimension_numbers = #tpu.dot_dimension_numbers<[1], [0], [0], [1], [0, 0, 1, 1], [], []>} : vector<16x32xbf16>, vector<32x64xbf16>, vector<16x64xf32> -> vector<16x64xf32>
    %c0_4 = arith.constant 0 : index
    %c0_5 = arith.constant 0 : index
    %5 = vector.load %arg3[%c0_4, %c0_5] : memref<1x64xf32, #tpu.memory_space<vmem>>, vector<1x64xf32>
    %6 = vector.broadcast %5 : vector<1x64xf32> to vector<16x64xf32>
    %7 = arith.addf %4, %6 : vector<16x64xf32>
    %8 = vector.extract_strided_slice %7 {offsets = [0, 0], sizes = [16, 32], strides = [1, 1]} : vector<16x64xf32> to vector<16x32xf32>
    %9 = vector.extract_strided_slice %7 {offsets = [0, 32], sizes = [16, 32], strides = [1, 1]} : vector<16x64xf32> to vector<16x32xf32>
    %10 = arith.negf %9 : vector<16x32xf32>
    %11 = math.exp %10 : vector<16x32xf32>
    %cst_6 = arith.constant 1.000000e+00 : f32
    %12 = vector.broadcast %cst_6 : f32 to vector<16x32xf32>
    %13 = arith.addf %12, %11 : vector<16x32xf32>
    %14 = arith.divf %12, %13 : vector<16x32xf32>
    %15 = arith.mulf %8, %14 : vector<16x32xf32>
    %16 = arith.truncf %15 : vector<16x32xf32> to vector<16x32xbf16>
    %c0_7 = arith.constant 0 : index
    %c0_8 = arith.constant 0 : index
    %17 = vector.load %arg4[%c0_7, %c0_8] : memref<32x120xbf16, #tpu.memory_space<vmem>>, vector<32x120xbf16>
    %cst_9 = arith.constant dense<0.000000e+00> : vector<16x120xf32>
    %18 = tpu.matmul %16, %17, %cst_9 {dimension_numbers = #tpu.dot_dimension_numbers<[1], [0], [0], [1], [0, 0, 1, 1], [], []>} : vector<16x32xbf16>, vector<32x120xbf16>, vector<16x120xf32> -> vector<16x120xf32>
    %c0_10 = arith.constant 0 : index
    %c0_11 = arith.constant 0 : index
    %19 = vector.load %arg5[%c0_10, %c0_11] : memref<1x120xf32, #tpu.memory_space<vmem>>, vector<1x120xf32>
    %20 = vector.broadcast %19 : vector<1x120xf32> to vector<16x120xf32>
    %21 = arith.addf %18, %20 : vector<16x120xf32>
    %cst_12 = arith.constant 0.000000e+00 : f32
    %22 = vector.broadcast %cst_12 : f32 to vector<16x32xf32>
    %c0_13 = arith.constant 0 : index
    %c0_14 = arith.constant 0 : index
    %23 = vector.load %arg11[%c0_13, %c0_14] : memref<32x32xf32, #tpu.memory_space<vmem>>, vector<16x32xf32>
    tpu.vector_store %arg11[%c0_13, %c0_14], %22 {strides = array<i32>} : memref<32x32xf32, #tpu.memory_space<vmem>>, vector<16x32xf32>,
    %c16 = arith.constant 16 : index
    %c0_15 = arith.constant 0 : index
    %24 = vector.load %arg11[%c16, %c0_15] : memref<32x32xf32, #tpu.memory_space<vmem>>, vector<16x32xf32>
    tpu.vector_store %arg11[%c16, %c0_15], %15 {strides = array<i32>} : memref<32x32xf32, #tpu.memory_space<vmem>>, vector<16x32xf32>,
    %c0_16 = arith.constant 0 : index
    %c0_17 = arith.constant 0 : index
    %25 = vector.load %arg6[%c0_16, %c0_17] : memref<4x15xf32, #tpu.memory_space<vmem>>, vector<4x15xf32>
    %26 = vector.extract_strided_slice %21 {offsets = [0, 0], sizes = [16, 15], strides = [1, 1]} : vector<16x120xf32> to vector<16x15xf32>
    %27 = vector.extract_strided_slice %21 {offsets = [0, 15], sizes = [16, 15], strides = [1, 1]} : vector<16x120xf32> to vector<16x15xf32>
    %28 = arith.negf %27 : vector<16x15xf32>
    %29 = math.exp %28 : vector<16x15xf32>
    %cst_18 = arith.constant 1.000000e+00 : f32
    %30 = vector.broadcast %cst_18 : f32 to vector<16x15xf32>
    %31 = arith.addf %30, %29 : vector<16x15xf32>
    %32 = arith.divf %30, %31 : vector<16x15xf32>
    %33 = arith.mulf %32, %26 : vector<16x15xf32>
    %34 = vector.extract_strided_slice %25 {offsets = [0, 0], sizes = [1, 15], strides = [1, 1]} : vector<4x15xf32> to vector<1x15xf32>
    %35 = vector.broadcast %34 : vector<1x15xf32> to vector<16x15xf32>
    %36 = arith.addf %33, %35 : vector<16x15xf32>
    %cst_19 = arith.constant dense<0xFF800000> : vector<16xf32>
    %37 = vector.multi_reduction <maximumf>, %36, %cst_19 [1] : vector<16x15xf32> to vector<16xf32>
    %38 = vector.shape_cast %37 : vector<16xf32> to vector<16x1xf32>
    %cst_20 = arith.constant -1.000000e+04 : f32
    %39 = vector.broadcast %cst_20 : f32 to vector<16x1xf32>
    %40 = arith.maximumf %38, %39 : vector<16x1xf32>
    %41 = vector.broadcast %40 : vector<16x1xf32> to vector<16x15xf32>
    %42 = arith.subf %36, %41 : vector<16x15xf32>
    %43 = math.exp %42 : vector<16x15xf32>
    %cst_21 = arith.constant dense<0.000000e+00> : vector<16xf32>
    %44 = vector.multi_reduction <add>, %43, %cst_21 [1] : vector<16x15xf32> to vector<16xf32>
    %45 = vector.shape_cast %44 : vector<16xf32> to vector<16x1xf32>
    %cst_22 = arith.constant -1.000000e+04 : f32
    %46 = vector.broadcast %cst_22 : f32 to vector<16x1xf32>
    %47 = arith.subf %46, %40 : vector<16x1xf32>
    %48 = math.exp %47 : vector<16x1xf32>
    %cst_23 = arith.constant 1.500000e+01 : f32
    %49 = vector.broadcast %cst_23 : f32 to vector<16x1xf32>
    %50 = arith.mulf %49, %48 : vector<16x1xf32>
    %51 = arith.addf %45, %50 : vector<16x1xf32>
    %52 = tpu.reciprocal %51 {approx = true} : vector<16x1xf32> -> vector<16x1xf32>
    %53 = vector.broadcast %52 : vector<16x1xf32> to vector<16x15xf32>
    %54 = arith.mulf %43, %53 : vector<16x15xf32>
    %cst_24 = arith.constant 0.000000e+00 : f32
    %55 = vector.broadcast %cst_24 : f32 to vector<16x8xf32>
    %56 = vector.extract_strided_slice %54 {offsets = [0, 0], sizes = [16, 1], strides = [1, 1]} : vector<16x15xf32> to vector<16x1xf32>
    %c2 = arith.constant 2 : index
    %c0_25 = arith.constant 0 : index
    %57 = vector.load %arg11[%c2, %c0_25] : memref<32x32xf32, #tpu.memory_space<vmem>>, vector<16x8xf32>
    %58 = vector.broadcast %56 : vector<16x1xf32> to vector<16x8xf32>
    %59 = arith.mulf %58, %57 : vector<16x8xf32>
    %60 = arith.addf %55, %59 : vector<16x8xf32>
    %61 = vector.extract_strided_slice %54 {offsets = [0, 1], sizes = [16, 1], strides = [1, 1]} : vector<16x15xf32> to vector<16x1xf32>
    %c3 = arith.constant 3 : index
    %c0_26 = arith.constant 0 : index
    %62 = vector.load %arg11[%c3, %c0_26] : memref<32x32xf32, #tpu.memory_space<vmem>>, vector<16x8xf32>
    %63 = vector.broadcast %61 : vector<16x1xf32> to vector<16x8xf32>
    %64 = arith.mulf %63, %62 : vector<16x8xf32>
    %65 = arith.addf %60, %64 : vector<16x8xf32>
    %66 = vector.extract_strided_slice %54 {offsets = [0, 2], sizes = [16, 1], strides = [1, 1]} : vector<16x15xf32> to vector<16x1xf32>
    %c4 = arith.constant 4 : index
    %c0_27 = arith.constant 0 : index
    %67 = vector.load %arg11[%c4, %c0_27] : memref<32x32xf32, #tpu.memory_space<vmem>>, vector<16x8xf32>
    %68 = vector.broadcast %66 : vector<16x1xf32> to vector<16x8xf32>
    %69 = arith.mulf %68, %67 : vector<16x8xf32>
    %70 = arith.addf %65, %69 : vector<16x8xf32>
    %71 = vector.extract_strided_slice %54 {offsets = [0, 3], sizes = [16, 1], strides = [1, 1]} : vector<16x15xf32> to vector<16x1xf32>
    %c5 = arith.constant 5 : index
    %c0_28 = arith.constant 0 : index
    %72 = vector.load %arg11[%c5, %c0_28] : memref<32x32xf32, #tpu.memory_space<vmem>>, vector<16x8xf32>
    %73 = vector.broadcast %71 : vector<16x1xf32> to vector<16x8xf32>
    %74 = arith.mulf %73, %72 : vector<16x8xf32>
    %75 = arith.addf %70, %74 : vector<16x8xf32>
    %76 = vector.extract_strided_slice %54 {offsets = [0, 4], sizes = [16, 1], strides = [1, 1]} : vector<16x15xf32> to vector<16x1xf32>
    %c6 = arith.constant 6 : index
    %c0_29 = arith.constant 0 : index
    %77 = vector.load %arg11[%c6, %c0_29] : memref<32x32xf32, #tpu.memory_space<vmem>>, vector<16x8xf32>
    %78 = vector.broadcast %76 : vector<16x1xf32> to vector<16x8xf32>
    %79 = arith.mulf %78, %77 : vector<16x8xf32>
    %80 = arith.addf %75, %79 : vector<16x8xf32>
    %81 = vector.extract_strided_slice %54 {offsets = [0, 5], sizes = [16, 1], strides = [1, 1]} : vector<16x15xf32> to vector<16x1xf32>
    %c7 = arith.constant 7 : index
    %c0_30 = arith.constant 0 : index
    %82 = vector.load %arg11[%c7, %c0_30] : memref<32x32xf32, #tpu.memory_space<vmem>>, vector<16x8xf32>
    %83 = vector.broadcast %81 : vector<16x1xf32> to vector<16x8xf32>
    %84 = arith.mulf %83, %82 : vector<16x8xf32>
    %85 = arith.addf %80, %84 : vector<16x8xf32>
    %86 = vector.extract_strided_slice %54 {offsets = [0, 6], sizes = [16, 1], strides = [1, 1]} : vector<16x15xf32> to vector<16x1xf32>
    %c8 = arith.constant 8 : index
    %c0_31 = arith.constant 0 : index
    %87 = vector.load %arg11[%c8, %c0_31] : memref<32x32xf32, #tpu.memory_space<vmem>>, vector<16x8xf32>
    %88 = vector.broadcast %86 : vector<16x1xf32> to vector<16x8xf32>
    %89 = arith.mulf %88, %87 : vector<16x8xf32>
    %90 = arith.addf %85, %89 : vector<16x8xf32>
    %91 = vector.extract_strided_slice %54 {offsets = [0, 7], sizes = [16, 1], strides = [1, 1]} : vector<16x15xf32> to vector<16x1xf32>
    %c9 = arith.constant 9 : index
    %c0_32 = arith.constant 0 : index
    %92 = vector.load %arg11[%c9, %c0_32] : memref<32x32xf32, #tpu.memory_space<vmem>>, vector<16x8xf32>
    %93 = vector.broadcast %91 : vector<16x1xf32> to vector<16x8xf32>
    %94 = arith.mulf %93, %92 : vector<16x8xf32>
    %95 = arith.addf %90, %94 : vector<16x8xf32>
    %96 = vector.extract_strided_slice %54 {offsets = [0, 8], sizes = [16, 1], strides = [1, 1]} : vector<16x15xf32> to vector<16x1xf32>
    %c10 = arith.constant 10 : index
    %c0_33 = arith.constant 0 : index
    %97 = vector.load %arg11[%c10, %c0_33] : memref<32x32xf32, #tpu.memory_space<vmem>>, vector<16x8xf32>
    %98 = vector.broadcast %96 : vector<16x1xf32> to vector<16x8xf32>
    %99 = arith.mulf %98, %97 : vector<16x8xf32>
    %100 = arith.addf %95, %99 : vector<16x8xf32>
    %101 = vector.extract_strided_slice %54 {offsets = [0, 9], sizes = [16, 1], strides = [1, 1]} : vector<16x15xf32> to vector<16x1xf32>
    %c11 = arith.constant 11 : index
    %c0_34 = arith.constant 0 : index
    %102 = vector.load %arg11[%c11, %c0_34] : memref<32x32xf32, #tpu.memory_space<vmem>>, vector<16x8xf32>
    %103 = vector.broadcast %101 : vector<16x1xf32> to vector<16x8xf32>
    %104 = arith.mulf %103, %102 : vector<16x8xf32>
    %105 = arith.addf %100, %104 : vector<16x8xf32>
    %106 = vector.extract_strided_slice %54 {offsets = [0, 10], sizes = [16, 1], strides = [1, 1]} : vector<16x15xf32> to vector<16x1xf32>
    %c12 = arith.constant 12 : index
    %c0_35 = arith.constant 0 : index
    %107 = vector.load %arg11[%c12, %c0_35] : memref<32x32xf32, #tpu.memory_space<vmem>>, vector<16x8xf32>
    %108 = vector.broadcast %106 : vector<16x1xf32> to vector<16x8xf32>
    %109 = arith.mulf %108, %107 : vector<16x8xf32>
    %110 = arith.addf %105, %109 : vector<16x8xf32>
    %111 = vector.extract_strided_slice %54 {offsets = [0, 11], sizes = [16, 1], strides = [1, 1]} : vector<16x15xf32> to vector<16x1xf32>
    %c13 = arith.constant 13 : index
    %c0_36 = arith.constant 0 : index
    %112 = vector.load %arg11[%c13, %c0_36] : memref<32x32xf32, #tpu.memory_space<vmem>>, vector<16x8xf32>
    %113 = vector.broadcast %111 : vector<16x1xf32> to vector<16x8xf32>
    %114 = arith.mulf %113, %112 : vector<16x8xf32>
    %115 = arith.addf %110, %114 : vector<16x8xf32>
    %116 = vector.extract_strided_slice %54 {offsets = [0, 12], sizes = [16, 1], strides = [1, 1]} : vector<16x15xf32> to vector<16x1xf32>
    %c14 = arith.constant 14 : index
    %c0_37 = arith.constant 0 : index
    %117 = vector.load %arg11[%c14, %c0_37] : memref<32x32xf32, #tpu.memory_space<vmem>>, vector<16x8xf32>
    %118 = vector.broadcast %116 : vector<16x1xf32> to vector<16x8xf32>
    %119 = arith.mulf %118, %117 : vector<16x8xf32>
    %120 = arith.addf %115, %119 : vector<16x8xf32>
    %121 = vector.extract_strided_slice %54 {offsets = [0, 13], sizes = [16, 1], strides = [1, 1]} : vector<16x15xf32> to vector<16x1xf32>
    %c15 = arith.constant 15 : index
    %c0_38 = arith.constant 0 : index
    %122 = vector.load %arg11[%c15, %c0_38] : memref<32x32xf32, #tpu.memory_space<vmem>>, vector<16x8xf32>
    %123 = vector.broadcast %121 : vector<16x1xf32> to vector<16x8xf32>
    %124 = arith.mulf %123, %122 : vector<16x8xf32>
    %125 = arith.addf %120, %124 : vector<16x8xf32>
    %126 = vector.extract_strided_slice %54 {offsets = [0, 14], sizes = [16, 1], strides = [1, 1]} : vector<16x15xf32> to vector<16x1xf32>
    %c16_39 = arith.constant 16 : index
    %c0_40 = arith.constant 0 : index
    %127 = vector.load %arg11[%c16_39, %c0_40] : memref<32x32xf32, #tpu.memory_space<vmem>>, vector<16x8xf32>
    %128 = vector.broadcast %126 : vector<16x1xf32> to vector<16x8xf32>
    %129 = arith.mulf %128, %127 : vector<16x8xf32>
    %130 = arith.addf %125, %129 : vector<16x8xf32>
    %131 = arith.truncf %130 : vector<16x8xf32> to vector<16x8xbf16>
    %c0_41 = arith.constant 0 : index
    %c0_42 = arith.constant 0 : index
    %132 = vector.load %arg12[%c0_41, %c0_42] : memref<16x32xbf16, #tpu.memory_space<vmem>>, vector<16x8xbf16>
    tpu.vector_store %arg12[%c0_41, %c0_42], %131 {strides = array<i32>} : memref<16x32xbf16, #tpu.memory_space<vmem>>, vector<16x8xbf16>,
    %133 = vector.extract_strided_slice %21 {offsets = [0, 30], sizes = [16, 15], strides = [1, 1]} : vector<16x120xf32> to vector<16x15xf32>
    %134 = vector.extract_strided_slice %21 {offsets = [0, 45], sizes = [16, 15], strides = [1, 1]} : vector<16x120xf32> to vector<16x15xf32>
    %135 = arith.negf %134 : vector<16x15xf32>
    %136 = math.exp %135 : vector<16x15xf32>
    %cst_43 = arith.constant 1.000000e+00 : f32
    %137 = vector.broadcast %cst_43 : f32 to vector<16x15xf32>
    %138 = arith.addf %137, %136 : vector<16x15xf32>
    %139 = arith.divf %137, %138 : vector<16x15xf32>
    %140 = arith.mulf %139, %133 : vector<16x15xf32>
    %141 = vector.extract_strided_slice %25 {offsets = [1, 0], sizes = [1, 15], strides = [1, 1]} : vector<4x15xf32> to vector<1x15xf32>
    %142 = vector.broadcast %141 : vector<1x15xf32> to vector<16x15xf32>
    %143 = arith.addf %140, %142 : vector<16x15xf32>
    %cst_44 = arith.constant dense<0xFF800000> : vector<16xf32>
    %144 = vector.multi_reduction <maximumf>, %143, %cst_44 [1] : vector<16x15xf32> to vector<16xf32>
    %145 = vector.shape_cast %144 : vector<16xf32> to vector<16x1xf32>
    %cst_45 = arith.constant -1.000000e+04 : f32
    %146 = vector.broadcast %cst_45 : f32 to vector<16x1xf32>
    %147 = arith.maximumf %145, %146 : vector<16x1xf32>
    %148 = vector.broadcast %147 : vector<16x1xf32> to vector<16x15xf32>
    %149 = arith.subf %143, %148 : vector<16x15xf32>
    %150 = math.exp %149 : vector<16x15xf32>
    %cst_46 = arith.constant dense<0.000000e+00> : vector<16xf32>
    %151 = vector.multi_reduction <add>, %150, %cst_46 [1] : vector<16x15xf32> to vector<16xf32>
    %152 = vector.shape_cast %151 : vector<16xf32> to vector<16x1xf32>
    %cst_47 = arith.constant -1.000000e+04 : f32
    %153 = vector.broadcast %cst_47 : f32 to vector<16x1xf32>
    %154 = arith.subf %153, %147 : vector<16x1xf32>
    %155 = math.exp %154 : vector<16x1xf32>
    %cst_48 = arith.constant 1.500000e+01 : f32
    %156 = vector.broadcast %cst_48 : f32 to vector<16x1xf32>
    %157 = arith.mulf %156, %155 : vector<16x1xf32>
    %158 = arith.addf %152, %157 : vector<16x1xf32>
    %159 = tpu.reciprocal %158 {approx = true} : vector<16x1xf32> -> vector<16x1xf32>
    %160 = vector.broadcast %159 : vector<16x1xf32> to vector<16x15xf32>
    %161 = arith.mulf %150, %160 : vector<16x15xf32>
    %cst_49 = arith.constant 0.000000e+00 : f32
    %162 = vector.broadcast %cst_49 : f32 to vector<16x8xf32>
    %163 = vector.extract_strided_slice %161 {offsets = [0, 0], sizes = [16, 1], strides = [1, 1]} : vector<16x15xf32> to vector<16x1xf32>
    %c2_50 = arith.constant 2 : index
    %c8_51 = arith.constant 8 : index
    %164 = vector.load %arg11[%c2_50, %c8_51] : memref<32x32xf32, #tpu.memory_space<vmem>>, vector<16x8xf32>
    %165 = vector.broadcast %163 : vector<16x1xf32> to vector<16x8xf32>
    %166 = arith.mulf %165, %164 : vector<16x8xf32>
    %167 = arith.addf %162, %166 : vector<16x8xf32>
    %168 = vector.extract_strided_slice %161 {offsets = [0, 1], sizes = [16, 1], strides = [1, 1]} : vector<16x15xf32> to vector<16x1xf32>
    %c3_52 = arith.constant 3 : index
    %c8_53 = arith.constant 8 : index
    %169 = vector.load %arg11[%c3_52, %c8_53] : memref<32x32xf32, #tpu.memory_space<vmem>>, vector<16x8xf32>
    %170 = vector.broadcast %168 : vector<16x1xf32> to vector<16x8xf32>
    %171 = arith.mulf %170, %169 : vector<16x8xf32>
    %172 = arith.addf %167, %171 : vector<16x8xf32>
    %173 = vector.extract_strided_slice %161 {offsets = [0, 2], sizes = [16, 1], strides = [1, 1]} : vector<16x15xf32> to vector<16x1xf32>
    %c4_54 = arith.constant 4 : index
    %c8_55 = arith.constant 8 : index
    %174 = vector.load %arg11[%c4_54, %c8_55] : memref<32x32xf32, #tpu.memory_space<vmem>>, vector<16x8xf32>
    %175 = vector.broadcast %173 : vector<16x1xf32> to vector<16x8xf32>
    %176 = arith.mulf %175, %174 : vector<16x8xf32>
    %177 = arith.addf %172, %176 : vector<16x8xf32>
    %178 = vector.extract_strided_slice %161 {offsets = [0, 3], sizes = [16, 1], strides = [1, 1]} : vector<16x15xf32> to vector<16x1xf32>
    %c5_56 = arith.constant 5 : index
    %c8_57 = arith.constant 8 : index
    %179 = vector.load %arg11[%c5_56, %c8_57] : memref<32x32xf32, #tpu.memory_space<vmem>>, vector<16x8xf32>
    %180 = vector.broadcast %178 : vector<16x1xf32> to vector<16x8xf32>
    %181 = arith.mulf %180, %179 : vector<16x8xf32>
    %182 = arith.addf %177, %181 : vector<16x8xf32>
    %183 = vector.extract_strided_slice %161 {offsets = [0, 4], sizes = [16, 1], strides = [1, 1]} : vector<16x15xf32> to vector<16x1xf32>
    %c6_58 = arith.constant 6 : index
    %c8_59 = arith.constant 8 : index
    %184 = vector.load %arg11[%c6_58, %c8_59] : memref<32x32xf32, #tpu.memory_space<vmem>>, vector<16x8xf32>
    %185 = vector.broadcast %183 : vector<16x1xf32> to vector<16x8xf32>
    %186 = arith.mulf %185, %184 : vector<16x8xf32>
    %187 = arith.addf %182, %186 : vector<16x8xf32>
    %188 = vector.extract_strided_slice %161 {offsets = [0, 5], sizes = [16, 1], strides = [1, 1]} : vector<16x15xf32> to vector<16x1xf32>
    %c7_60 = arith.constant 7 : index
    %c8_61 = arith.constant 8 : index
    %189 = vector.load %arg11[%c7_60, %c8_61] : memref<32x32xf32, #tpu.memory_space<vmem>>, vector<16x8xf32>
    %190 = vector.broadcast %188 : vector<16x1xf32> to vector<16x8xf32>
    %191 = arith.mulf %190, %189 : vector<16x8xf32>
    %192 = arith.addf %187, %191 : vector<16x8xf32>
    %193 = vector.extract_strided_slice %161 {offsets = [0, 6], sizes = [16, 1], strides = [1, 1]} : vector<16x15xf32> to vector<16x1xf32>
    %c8_62 = arith.constant 8 : index
    %c8_63 = arith.constant 8 : index
    %194 = vector.load %arg11[%c8_62, %c8_63] : memref<32x32xf32, #tpu.memory_space<vmem>>, vector<16x8xf32>
    %195 = vector.broadcast %193 : vector<16x1xf32> to vector<16x8xf32>
    %196 = arith.mulf %195, %194 : vector<16x8xf32>
    %197 = arith.addf %192, %196 : vector<16x8xf32>
    %198 = vector.extract_strided_slice %161 {offsets = [0, 7], sizes = [16, 1], strides = [1, 1]} : vector<16x15xf32> to vector<16x1xf32>
    %c9_64 = arith.constant 9 : index
    %c8_65 = arith.constant 8 : index
    %199 = vector.load %arg11[%c9_64, %c8_65] : memref<32x32xf32, #tpu.memory_space<vmem>>, vector<16x8xf32>
    %200 = vector.broadcast %198 : vector<16x1xf32> to vector<16x8xf32>
    %201 = arith.mulf %200, %199 : vector<16x8xf32>
    %202 = arith.addf %197, %201 : vector<16x8xf32>
    %203 = vector.extract_strided_slice %161 {offsets = [0, 8], sizes = [16, 1], strides = [1, 1]} : vector<16x15xf32> to vector<16x1xf32>
    %c10_66 = arith.constant 10 : index
    %c8_67 = arith.constant 8 : index
    %204 = vector.load %arg11[%c10_66, %c8_67] : memref<32x32xf32, #tpu.memory_space<vmem>>, vector<16x8xf32>
    %205 = vector.broadcast %203 : vector<16x1xf32> to vector<16x8xf32>
    %206 = arith.mulf %205, %204 : vector<16x8xf32>
    %207 = arith.addf %202, %206 : vector<16x8xf32>
    %208 = vector.extract_strided_slice %161 {offsets = [0, 9], sizes = [16, 1], strides = [1, 1]} : vector<16x15xf32> to vector<16x1xf32>
    %c11_68 = arith.constant 11 : index
    %c8_69 = arith.constant 8 : index
    %209 = vector.load %arg11[%c11_68, %c8_69] : memref<32x32xf32, #tpu.memory_space<vmem>>, vector<16x8xf32>
    %210 = vector.broadcast %208 : vector<16x1xf32> to vector<16x8xf32>
    %211 = arith.mulf %210, %209 : vector<16x8xf32>
    %212 = arith.addf %207, %211 : vector<16x8xf32>
    %213 = vector.extract_strided_slice %161 {offsets = [0, 10], sizes = [16, 1], strides = [1, 1]} : vector<16x15xf32> to vector<16x1xf32>
    %c12_70 = arith.constant 12 : index
    %c8_71 = arith.constant 8 : index
    %214 = vector.load %arg11[%c12_70, %c8_71] : memref<32x32xf32, #tpu.memory_space<vmem>>, vector<16x8xf32>
    %215 = vector.broadcast %213 : vector<16x1xf32> to vector<16x8xf32>
    %216 = arith.mulf %215, %214 : vector<16x8xf32>
    %217 = arith.addf %212, %216 : vector<16x8xf32>
    %218 = vector.extract_strided_slice %161 {offsets = [0, 11], sizes = [16, 1], strides = [1, 1]} : vector<16x15xf32> to vector<16x1xf32>
    %c13_72 = arith.constant 13 : index
    %c8_73 = arith.constant 8 : index
    %219 = vector.load %arg11[%c13_72, %c8_73] : memref<32x32xf32, #tpu.memory_space<vmem>>, vector<16x8xf32>
    %220 = vector.broadcast %218 : vector<16x1xf32> to vector<16x8xf32>
    %221 = arith.mulf %220, %219 : vector<16x8xf32>
    %222 = arith.addf %217, %221 : vector<16x8xf32>
    %223 = vector.extract_strided_slice %161 {offsets = [0, 12], sizes = [16, 1], strides = [1, 1]} : vector<16x15xf32> to vector<16x1xf32>
    %c14_74 = arith.constant 14 : index
    %c8_75 = arith.constant 8 : index
    %224 = vector.load %arg11[%c14_74, %c8_75] : memref<32x32xf32, #tpu.memory_space<vmem>>, vector<16x8xf32>
    %225 = vector.broadcast %223 : vector<16x1xf32> to vector<16x8xf32>
    %226 = arith.mulf %225, %224 : vector<16x8xf32>
    %227 = arith.addf %222, %226 : vector<16x8xf32>
    %228 = vector.extract_strided_slice %161 {offsets = [0, 13], sizes = [16, 1], strides = [1, 1]} : vector<16x15xf32> to vector<16x1xf32>
    %c15_76 = arith.constant 15 : index
    %c8_77 = arith.constant 8 : index
    %229 = vector.load %arg11[%c15_76, %c8_77] : memref<32x32xf32, #tpu.memory_space<vmem>>, vector<16x8xf32>
    %230 = vector.broadcast %228 : vector<16x1xf32> to vector<16x8xf32>
    %231 = arith.mulf %230, %229 : vector<16x8xf32>
    %232 = arith.addf %227, %231 : vector<16x8xf32>
    %233 = vector.extract_strided_slice %161 {offsets = [0, 14], sizes = [16, 1], strides = [1, 1]} : vector<16x15xf32> to vector<16x1xf32>
    %c16_78 = arith.constant 16 : index
    %c8_79 = arith.constant 8 : index
    %234 = vector.load %arg11[%c16_78, %c8_79] : memref<32x32xf32, #tpu.memory_space<vmem>>, vector<16x8xf32>
    %235 = vector.broadcast %233 : vector<16x1xf32> to vector<16x8xf32>
    %236 = arith.mulf %235, %234 : vector<16x8xf32>
    %237 = arith.addf %232, %236 : vector<16x8xf32>
    %238 = arith.truncf %237 : vector<16x8xf32> to vector<16x8xbf16>
    %c0_80 = arith.constant 0 : index
    %c8_81 = arith.constant 8 : index
    %239 = vector.load %arg12[%c0_80, %c8_81] : memref<16x32xbf16, #tpu.memory_space<vmem>>, vector<16x8xbf16>
    tpu.vector_store %arg12[%c0_80, %c8_81], %238 {strides = array<i32>} : memref<16x32xbf16, #tpu.memory_space<vmem>>, vector<16x8xbf16>,
    %240 = vector.extract_strided_slice %21 {offsets = [0, 60], sizes = [16, 15], strides = [1, 1]} : vector<16x120xf32> to vector<16x15xf32>
    %241 = vector.extract_strided_slice %21 {offsets = [0, 75], sizes = [16, 15], strides = [1, 1]} : vector<16x120xf32> to vector<16x15xf32>
    %242 = arith.negf %241 : vector<16x15xf32>
    %243 = math.exp %242 : vector<16x15xf32>
    %cst_82 = arith.constant 1.000000e+00 : f32
    %244 = vector.broadcast %cst_82 : f32 to vector<16x15xf32>
    %245 = arith.addf %244, %243 : vector<16x15xf32>
    %246 = arith.divf %244, %245 : vector<16x15xf32>
    %247 = arith.mulf %246, %240 : vector<16x15xf32>
    %248 = vector.extract_strided_slice %25 {offsets = [2, 0], sizes = [1, 15], strides = [1, 1]} : vector<4x15xf32> to vector<1x15xf32>
    %249 = vector.broadcast %248 : vector<1x15xf32> to vector<16x15xf32>
    %250 = arith.addf %247, %249 : vector<16x15xf32>
    %cst_83 = arith.constant dense<0xFF800000> : vector<16xf32>
    %251 = vector.multi_reduction <maximumf>, %250, %cst_83 [1] : vector<16x15xf32> to vector<16xf32>
    %252 = vector.shape_cast %251 : vector<16xf32> to vector<16x1xf32>
    %cst_84 = arith.constant -1.000000e+04 : f32
    %253 = vector.broadcast %cst_84 : f32 to vector<16x1xf32>
    %254 = arith.maximumf %252, %253 : vector<16x1xf32>
    %255 = vector.broadcast %254 : vector<16x1xf32> to vector<16x15xf32>
    %256 = arith.subf %250, %255 : vector<16x15xf32>
    %257 = math.exp %256 : vector<16x15xf32>
    %cst_85 = arith.constant dense<0.000000e+00> : vector<16xf32>
    %258 = vector.multi_reduction <add>, %257, %cst_85 [1] : vector<16x15xf32> to vector<16xf32>
    %259 = vector.shape_cast %258 : vector<16xf32> to vector<16x1xf32>
    %cst_86 = arith.constant -1.000000e+04 : f32
    %260 = vector.broadcast %cst_86 : f32 to vector<16x1xf32>
    %261 = arith.subf %260, %254 : vector<16x1xf32>
    %262 = math.exp %261 : vector<16x1xf32>
    %cst_87 = arith.constant 1.500000e+01 : f32
    %263 = vector.broadcast %cst_87 : f32 to vector<16x1xf32>
    %264 = arith.mulf %263, %262 : vector<16x1xf32>
    %265 = arith.addf %259, %264 : vector<16x1xf32>
    %266 = tpu.reciprocal %265 {approx = true} : vector<16x1xf32> -> vector<16x1xf32>
    %267 = vector.broadcast %266 : vector<16x1xf32> to vector<16x15xf32>
    %268 = arith.mulf %257, %267 : vector<16x15xf32>
    %cst_88 = arith.constant 0.000000e+00 : f32
    %269 = vector.broadcast %cst_88 : f32 to vector<16x8xf32>
    %270 = vector.extract_strided_slice %268 {offsets = [0, 0], sizes = [16, 1], strides = [1, 1]} : vector<16x15xf32> to vector<16x1xf32>
    %c2_89 = arith.constant 2 : index
    %c16_90 = arith.constant 16 : index
    %271 = vector.load %arg11[%c2_89, %c16_90] : memref<32x32xf32, #tpu.memory_space<vmem>>, vector<16x8xf32>
    %272 = vector.broadcast %270 : vector<16x1xf32> to vector<16x8xf32>
    %273 = arith.mulf %272, %271 : vector<16x8xf32>
    %274 = arith.addf %269, %273 : vector<16x8xf32>
    %275 = vector.extract_strided_slice %268 {offsets = [0, 1], sizes = [16, 1], strides = [1, 1]} : vector<16x15xf32> to vector<16x1xf32>
    %c3_91 = arith.constant 3 : index
    %c16_92 = arith.constant 16 : index
    %276 = vector.load %arg11[%c3_91, %c16_92] : memref<32x32xf32, #tpu.memory_space<vmem>>, vector<16x8xf32>
    %277 = vector.broadcast %275 : vector<16x1xf32> to vector<16x8xf32>
    %278 = arith.mulf %277, %276 : vector<16x8xf32>
    %279 = arith.addf %274, %278 : vector<16x8xf32>
    %280 = vector.extract_strided_slice %268 {offsets = [0, 2], sizes = [16, 1], strides = [1, 1]} : vector<16x15xf32> to vector<16x1xf32>
    %c4_93 = arith.constant 4 : index
    %c16_94 = arith.constant 16 : index
    %281 = vector.load %arg11[%c4_93, %c16_94] : memref<32x32xf32, #tpu.memory_space<vmem>>, vector<16x8xf32>
    %282 = vector.broadcast %280 : vector<16x1xf32> to vector<16x8xf32>
    %283 = arith.mulf %282, %281 : vector<16x8xf32>
    %284 = arith.addf %279, %283 : vector<16x8xf32>
    %285 = vector.extract_strided_slice %268 {offsets = [0, 3], sizes = [16, 1], strides = [1, 1]} : vector<16x15xf32> to vector<16x1xf32>
    %c5_95 = arith.constant 5 : index
    %c16_96 = arith.constant 16 : index
    %286 = vector.load %arg11[%c5_95, %c16_96] : memref<32x32xf32, #tpu.memory_space<vmem>>, vector<16x8xf32>
    %287 = vector.broadcast %285 : vector<16x1xf32> to vector<16x8xf32>
    %288 = arith.mulf %287, %286 : vector<16x8xf32>
    %289 = arith.addf %284, %288 : vector<16x8xf32>
    %290 = vector.extract_strided_slice %268 {offsets = [0, 4], sizes = [16, 1], strides = [1, 1]} : vector<16x15xf32> to vector<16x1xf32>
    %c6_97 = arith.constant 6 : index
    %c16_98 = arith.constant 16 : index
    %291 = vector.load %arg11[%c6_97, %c16_98] : memref<32x32xf32, #tpu.memory_space<vmem>>, vector<16x8xf32>
    %292 = vector.broadcast %290 : vector<16x1xf32> to vector<16x8xf32>
    %293 = arith.mulf %292, %291 : vector<16x8xf32>
    %294 = arith.addf %289, %293 : vector<16x8xf32>
    %295 = vector.extract_strided_slice %268 {offsets = [0, 5], sizes = [16, 1], strides = [1, 1]} : vector<16x15xf32> to vector<16x1xf32>
    %c7_99 = arith.constant 7 : index
    %c16_100 = arith.constant 16 : index
    %296 = vector.load %arg11[%c7_99, %c16_100] : memref<32x32xf32, #tpu.memory_space<vmem>>, vector<16x8xf32>
    %297 = vector.broadcast %295 : vector<16x1xf32> to vector<16x8xf32>
    %298 = arith.mulf %297, %296 : vector<16x8xf32>
    %299 = arith.addf %294, %298 : vector<16x8xf32>
    %300 = vector.extract_strided_slice %268 {offsets = [0, 6], sizes = [16, 1], strides = [1, 1]} : vector<16x15xf32> to vector<16x1xf32>
    %c8_101 = arith.constant 8 : index
    %c16_102 = arith.constant 16 : index
    %301 = vector.load %arg11[%c8_101, %c16_102] : memref<32x32xf32, #tpu.memory_space<vmem>>, vector<16x8xf32>
    %302 = vector.broadcast %300 : vector<16x1xf32> to vector<16x8xf32>
    %303 = arith.mulf %302, %301 : vector<16x8xf32>
    %304 = arith.addf %299, %303 : vector<16x8xf32>
    %305 = vector.extract_strided_slice %268 {offsets = [0, 7], sizes = [16, 1], strides = [1, 1]} : vector<16x15xf32> to vector<16x1xf32>
    %c9_103 = arith.constant 9 : index
    %c16_104 = arith.constant 16 : index
    %306 = vector.load %arg11[%c9_103, %c16_104] : memref<32x32xf32, #tpu.memory_space<vmem>>, vector<16x8xf32>
    %307 = vector.broadcast %305 : vector<16x1xf32> to vector<16x8xf32>
    %308 = arith.mulf %307, %306 : vector<16x8xf32>
    %309 = arith.addf %304, %308 : vector<16x8xf32>
    %310 = vector.extract_strided_slice %268 {offsets = [0, 8], sizes = [16, 1], strides = [1, 1]} : vector<16x15xf32> to vector<16x1xf32>
    %c10_105 = arith.constant 10 : index
    %c16_106 = arith.constant 16 : index
    %311 = vector.load %arg11[%c10_105, %c16_106] : memref<32x32xf32, #tpu.memory_space<vmem>>, vector<16x8xf32>
    %312 = vector.broadcast %310 : vector<16x1xf32> to vector<16x8xf32>
    %313 = arith.mulf %312, %311 : vector<16x8xf32>
    %314 = arith.addf %309, %313 : vector<16x8xf32>
    %315 = vector.extract_strided_slice %268 {offsets = [0, 9], sizes = [16, 1], strides = [1, 1]} : vector<16x15xf32> to vector<16x1xf32>
    %c11_107 = arith.constant 11 : index
    %c16_108 = arith.constant 16 : index
    %316 = vector.load %arg11[%c11_107, %c16_108] : memref<32x32xf32, #tpu.memory_space<vmem>>, vector<16x8xf32>
    %317 = vector.broadcast %315 : vector<16x1xf32> to vector<16x8xf32>
    %318 = arith.mulf %317, %316 : vector<16x8xf32>
    %319 = arith.addf %314, %318 : vector<16x8xf32>
    %320 = vector.extract_strided_slice %268 {offsets = [0, 10], sizes = [16, 1], strides = [1, 1]} : vector<16x15xf32> to vector<16x1xf32>
    %c12_109 = arith.constant 12 : index
    %c16_110 = arith.constant 16 : index
    %321 = vector.load %arg11[%c12_109, %c16_110] : memref<32x32xf32, #tpu.memory_space<vmem>>, vector<16x8xf32>
    %322 = vector.broadcast %320 : vector<16x1xf32> to vector<16x8xf32>
    %323 = arith.mulf %322, %321 : vector<16x8xf32>
    %324 = arith.addf %319, %323 : vector<16x8xf32>
    %325 = vector.extract_strided_slice %268 {offsets = [0, 11], sizes = [16, 1], strides = [1, 1]} : vector<16x15xf32> to vector<16x1xf32>
    %c13_111 = arith.constant 13 : index
    %c16_112 = arith.constant 16 : index
    %326 = vector.load %arg11[%c13_111, %c16_112] : memref<32x32xf32, #tpu.memory_space<vmem>>, vector<16x8xf32>
    %327 = vector.broadcast %325 : vector<16x1xf32> to vector<16x8xf32>
    %328 = arith.mulf %327, %326 : vector<16x8xf32>
    %329 = arith.addf %324, %328 : vector<16x8xf32>
    %330 = vector.extract_strided_slice %268 {offsets = [0, 12], sizes = [16, 1], strides = [1, 1]} : vector<16x15xf32> to vector<16x1xf32>
    %c14_113 = arith.constant 14 : index
    %c16_114 = arith.constant 16 : index
    %331 = vector.load %arg11[%c14_113, %c16_114] : memref<32x32xf32, #tpu.memory_space<vmem>>, vector<16x8xf32>
    %332 = vector.broadcast %330 : vector<16x1xf32> to vector<16x8xf32>
    %333 = arith.mulf %332, %331 : vector<16x8xf32>
    %334 = arith.addf %329, %333 : vector<16x8xf32>
    %335 = vector.extract_strided_slice %268 {offsets = [0, 13], sizes = [16, 1], strides = [1, 1]} : vector<16x15xf32> to vector<16x1xf32>
    %c15_115 = arith.constant 15 : index
    %c16_116 = arith.constant 16 : index
    %336 = vector.load %arg11[%c15_115, %c16_116] : memref<32x32xf32, #tpu.memory_space<vmem>>, vector<16x8xf32>
    %337 = vector.broadcast %335 : vector<16x1xf32> to vector<16x8xf32>
    %338 = arith.mulf %337, %336 : vector<16x8xf32>
    %339 = arith.addf %334, %338 : vector<16x8xf32>
    %340 = vector.extract_strided_slice %268 {offsets = [0, 14], sizes = [16, 1], strides = [1, 1]} : vector<16x15xf32> to vector<16x1xf32>
    %c16_117 = arith.constant 16 : index
    %c16_118 = arith.constant 16 : index
    %341 = vector.load %arg11[%c16_117, %c16_118] : memref<32x32xf32, #tpu.memory_space<vmem>>, vector<16x8xf32>
    %342 = vector.broadcast %340 : vector<16x1xf32> to vector<16x8xf32>
    %343 = arith.mulf %342, %341 : vector<16x8xf32>
    %344 = arith.addf %339, %343 : vector<16x8xf32>
    %345 = arith.truncf %344 : vector<16x8xf32> to vector<16x8xbf16>
    %c0_119 = arith.constant 0 : index
    %c16_120 = arith.constant 16 : index
    %346 = vector.load %arg12[%c0_119, %c16_120] : memref<16x32xbf16, #tpu.memory_space<vmem>>, vector<16x8xbf16>
    tpu.vector_store %arg12[%c0_119, %c16_120], %345 {strides = array<i32>} : memref<16x32xbf16, #tpu.memory_space<vmem>>, vector<16x8xbf16>,
    %347 = vector.extract_strided_slice %21 {offsets = [0, 90], sizes = [16, 15], strides = [1, 1]} : vector<16x120xf32> to vector<16x15xf32>
    %348 = vector.extract_strided_slice %21 {offsets = [0, 105], sizes = [16, 15], strides = [1, 1]} : vector<16x120xf32> to vector<16x15xf32>
    %349 = arith.negf %348 : vector<16x15xf32>
    %350 = math.exp %349 : vector<16x15xf32>
    %cst_121 = arith.constant 1.000000e+00 : f32
    %351 = vector.broadcast %cst_121 : f32 to vector<16x15xf32>
    %352 = arith.addf %351, %350 : vector<16x15xf32>
    %353 = arith.divf %351, %352 : vector<16x15xf32>
    %354 = arith.mulf %353, %347 : vector<16x15xf32>
    %355 = vector.extract_strided_slice %25 {offsets = [3, 0], sizes = [1, 15], strides = [1, 1]} : vector<4x15xf32> to vector<1x15xf32>
    %356 = vector.broadcast %355 : vector<1x15xf32> to vector<16x15xf32>
    %357 = arith.addf %354, %356 : vector<16x15xf32>
    %cst_122 = arith.constant dense<0xFF800000> : vector<16xf32>
    %358 = vector.multi_reduction <maximumf>, %357, %cst_122 [1] : vector<16x15xf32> to vector<16xf32>
    %359 = vector.shape_cast %358 : vector<16xf32> to vector<16x1xf32>
    %cst_123 = arith.constant -1.000000e+04 : f32
    %360 = vector.broadcast %cst_123 : f32 to vector<16x1xf32>
    %361 = arith.maximumf %359, %360 : vector<16x1xf32>
    %362 = vector.broadcast %361 : vector<16x1xf32> to vector<16x15xf32>
    %363 = arith.subf %357, %362 : vector<16x15xf32>
    %364 = math.exp %363 : vector<16x15xf32>
    %cst_124 = arith.constant dense<0.000000e+00> : vector<16xf32>
    %365 = vector.multi_reduction <add>, %364, %cst_124 [1] : vector<16x15xf32> to vector<16xf32>
    %366 = vector.shape_cast %365 : vector<16xf32> to vector<16x1xf32>
    %cst_125 = arith.constant -1.000000e+04 : f32
    %367 = vector.broadcast %cst_125 : f32 to vector<16x1xf32>
    %368 = arith.subf %367, %361 : vector<16x1xf32>
    %369 = math.exp %368 : vector<16x1xf32>
    %cst_126 = arith.constant 1.500000e+01 : f32
    %370 = vector.broadcast %cst_126 : f32 to vector<16x1xf32>
    %371 = arith.mulf %370, %369 : vector<16x1xf32>
    %372 = arith.addf %366, %371 : vector<16x1xf32>
    %373 = tpu.reciprocal %372 {approx = true} : vector<16x1xf32> -> vector<16x1xf32>
    %374 = vector.broadcast %373 : vector<16x1xf32> to vector<16x15xf32>
    %375 = arith.mulf %364, %374 : vector<16x15xf32>
    %cst_127 = arith.constant 0.000000e+00 : f32
    %376 = vector.broadcast %cst_127 : f32 to vector<16x8xf32>
    %377 = vector.extract_strided_slice %375 {offsets = [0, 0], sizes = [16, 1], strides = [1, 1]} : vector<16x15xf32> to vector<16x1xf32>
    %c2_128 = arith.constant 2 : index
    %c24 = arith.constant 24 : index
    %378 = vector.load %arg11[%c2_128, %c24] : memref<32x32xf32, #tpu.memory_space<vmem>>, vector<16x8xf32>
    %379 = vector.broadcast %377 : vector<16x1xf32> to vector<16x8xf32>
    %380 = arith.mulf %379, %378 : vector<16x8xf32>
    %381 = arith.addf %376, %380 : vector<16x8xf32>
    %382 = vector.extract_strided_slice %375 {offsets = [0, 1], sizes = [16, 1], strides = [1, 1]} : vector<16x15xf32> to vector<16x1xf32>
    %c3_129 = arith.constant 3 : index
    %c24_130 = arith.constant 24 : index
    %383 = vector.load %arg11[%c3_129, %c24_130] : memref<32x32xf32, #tpu.memory_space<vmem>>, vector<16x8xf32>
    %384 = vector.broadcast %382 : vector<16x1xf32> to vector<16x8xf32>
    %385 = arith.mulf %384, %383 : vector<16x8xf32>
    %386 = arith.addf %381, %385 : vector<16x8xf32>
    %387 = vector.extract_strided_slice %375 {offsets = [0, 2], sizes = [16, 1], strides = [1, 1]} : vector<16x15xf32> to vector<16x1xf32>
    %c4_131 = arith.constant 4 : index
    %c24_132 = arith.constant 24 : index
    %388 = vector.load %arg11[%c4_131, %c24_132] : memref<32x32xf32, #tpu.memory_space<vmem>>, vector<16x8xf32>
    %389 = vector.broadcast %387 : vector<16x1xf32> to vector<16x8xf32>
    %390 = arith.mulf %389, %388 : vector<16x8xf32>
    %391 = arith.addf %386, %390 : vector<16x8xf32>
    %392 = vector.extract_strided_slice %375 {offsets = [0, 3], sizes = [16, 1], strides = [1, 1]} : vector<16x15xf32> to vector<16x1xf32>
    %c5_133 = arith.constant 5 : index
    %c24_134 = arith.constant 24 : index
    %393 = vector.load %arg11[%c5_133, %c24_134] : memref<32x32xf32, #tpu.memory_space<vmem>>, vector<16x8xf32>
    %394 = vector.broadcast %392 : vector<16x1xf32> to vector<16x8xf32>
    %395 = arith.mulf %394, %393 : vector<16x8xf32>
    %396 = arith.addf %391, %395 : vector<16x8xf32>
    %397 = vector.extract_strided_slice %375 {offsets = [0, 4], sizes = [16, 1], strides = [1, 1]} : vector<16x15xf32> to vector<16x1xf32>
    %c6_135 = arith.constant 6 : index
    %c24_136 = arith.constant 24 : index
    %398 = vector.load %arg11[%c6_135, %c24_136] : memref<32x32xf32, #tpu.memory_space<vmem>>, vector<16x8xf32>
    %399 = vector.broadcast %397 : vector<16x1xf32> to vector<16x8xf32>
    %400 = arith.mulf %399, %398 : vector<16x8xf32>
    %401 = arith.addf %396, %400 : vector<16x8xf32>
    %402 = vector.extract_strided_slice %375 {offsets = [0, 5], sizes = [16, 1], strides = [1, 1]} : vector<16x15xf32> to vector<16x1xf32>
    %c7_137 = arith.constant 7 : index
    %c24_138 = arith.constant 24 : index
    %403 = vector.load %arg11[%c7_137, %c24_138] : memref<32x32xf32, #tpu.memory_space<vmem>>, vector<16x8xf32>
    %404 = vector.broadcast %402 : vector<16x1xf32> to vector<16x8xf32>
    %405 = arith.mulf %404, %403 : vector<16x8xf32>
    %406 = arith.addf %401, %405 : vector<16x8xf32>
    %407 = vector.extract_strided_slice %375 {offsets = [0, 6], sizes = [16, 1], strides = [1, 1]} : vector<16x15xf32> to vector<16x1xf32>
    %c8_139 = arith.constant 8 : index
    %c24_140 = arith.constant 24 : index
    %408 = vector.load %arg11[%c8_139, %c24_140] : memref<32x32xf32, #tpu.memory_space<vmem>>, vector<16x8xf32>
    %409 = vector.broadcast %407 : vector<16x1xf32> to vector<16x8xf32>
    %410 = arith.mulf %409, %408 : vector<16x8xf32>
    %411 = arith.addf %406, %410 : vector<16x8xf32>
    %412 = vector.extract_strided_slice %375 {offsets = [0, 7], sizes = [16, 1], strides = [1, 1]} : vector<16x15xf32> to vector<16x1xf32>
    %c9_141 = arith.constant 9 : index
    %c24_142 = arith.constant 24 : index
    %413 = vector.load %arg11[%c9_141, %c24_142] : memref<32x32xf32, #tpu.memory_space<vmem>>, vector<16x8xf32>
    %414 = vector.broadcast %412 : vector<16x1xf32> to vector<16x8xf32>
    %415 = arith.mulf %414, %413 : vector<16x8xf32>
    %416 = arith.addf %411, %415 : vector<16x8xf32>
    %417 = vector.extract_strided_slice %375 {offsets = [0, 8], sizes = [16, 1], strides = [1, 1]} : vector<16x15xf32> to vector<16x1xf32>
    %c10_143 = arith.constant 10 : index
    %c24_144 = arith.constant 24 : index
    %418 = vector.load %arg11[%c10_143, %c24_144] : memref<32x32xf32, #tpu.memory_space<vmem>>, vector<16x8xf32>
    %419 = vector.broadcast %417 : vector<16x1xf32> to vector<16x8xf32>
    %420 = arith.mulf %419, %418 : vector<16x8xf32>
    %421 = arith.addf %416, %420 : vector<16x8xf32>
    %422 = vector.extract_strided_slice %375 {offsets = [0, 9], sizes = [16, 1], strides = [1, 1]} : vector<16x15xf32> to vector<16x1xf32>
    %c11_145 = arith.constant 11 : index
    %c24_146 = arith.constant 24 : index
    %423 = vector.load %arg11[%c11_145, %c24_146] : memref<32x32xf32, #tpu.memory_space<vmem>>, vector<16x8xf32>
    %424 = vector.broadcast %422 : vector<16x1xf32> to vector<16x8xf32>
    %425 = arith.mulf %424, %423 : vector<16x8xf32>
    %426 = arith.addf %421, %425 : vector<16x8xf32>
    %427 = vector.extract_strided_slice %375 {offsets = [0, 10], sizes = [16, 1], strides = [1, 1]} : vector<16x15xf32> to vector<16x1xf32>
    %c12_147 = arith.constant 12 : index
    %c24_148 = arith.constant 24 : index
    %428 = vector.load %arg11[%c12_147, %c24_148] : memref<32x32xf32, #tpu.memory_space<vmem>>, vector<16x8xf32>
    %429 = vector.broadcast %427 : vector<16x1xf32> to vector<16x8xf32>
    %430 = arith.mulf %429, %428 : vector<16x8xf32>
    %431 = arith.addf %426, %430 : vector<16x8xf32>
    %432 = vector.extract_strided_slice %375 {offsets = [0, 11], sizes = [16, 1], strides = [1, 1]} : vector<16x15xf32> to vector<16x1xf32>
    %c13_149 = arith.constant 13 : index
    %c24_150 = arith.constant 24 : index
    %433 = vector.load %arg11[%c13_149, %c24_150] : memref<32x32xf32, #tpu.memory_space<vmem>>, vector<16x8xf32>
    %434 = vector.broadcast %432 : vector<16x1xf32> to vector<16x8xf32>
    %435 = arith.mulf %434, %433 : vector<16x8xf32>
    %436 = arith.addf %431, %435 : vector<16x8xf32>
    %437 = vector.extract_strided_slice %375 {offsets = [0, 12], sizes = [16, 1], strides = [1, 1]} : vector<16x15xf32> to vector<16x1xf32>
    %c14_151 = arith.constant 14 : index
    %c24_152 = arith.constant 24 : index
    %438 = vector.load %arg11[%c14_151, %c24_152] : memref<32x32xf32, #tpu.memory_space<vmem>>, vector<16x8xf32>
    %439 = vector.broadcast %437 : vector<16x1xf32> to vector<16x8xf32>
    %440 = arith.mulf %439, %438 : vector<16x8xf32>
    %441 = arith.addf %436, %440 : vector<16x8xf32>
    %442 = vector.extract_strided_slice %375 {offsets = [0, 13], sizes = [16, 1], strides = [1, 1]} : vector<16x15xf32> to vector<16x1xf32>
    %c15_153 = arith.constant 15 : index
    %c24_154 = arith.constant 24 : index
    %443 = vector.load %arg11[%c15_153, %c24_154] : memref<32x32xf32, #tpu.memory_space<vmem>>, vector<16x8xf32>
    %444 = vector.broadcast %442 : vector<16x1xf32> to vector<16x8xf32>
    %445 = arith.mulf %444, %443 : vector<16x8xf32>
    %446 = arith.addf %441, %445 : vector<16x8xf32>
    %447 = vector.extract_strided_slice %375 {offsets = [0, 14], sizes = [16, 1], strides = [1, 1]} : vector<16x15xf32> to vector<16x1xf32>
    %c16_155 = arith.constant 16 : index
    %c24_156 = arith.constant 24 : index
    %448 = vector.load %arg11[%c16_155, %c24_156] : memref<32x32xf32, #tpu.memory_space<vmem>>, vector<16x8xf32>
    %449 = vector.broadcast %447 : vector<16x1xf32> to vector<16x8xf32>
    %450 = arith.mulf %449, %448 : vector<16x8xf32>
    %451 = arith.addf %446, %450 : vector<16x8xf32>
    %452 = arith.truncf %451 : vector<16x8xf32> to vector<16x8xbf16>
    %c0_157 = arith.constant 0 : index
    %c24_158 = arith.constant 24 : index
    %453 = vector.load %arg12[%c0_157, %c24_158] : memref<16x32xbf16, #tpu.memory_space<vmem>>, vector<16x8xbf16>
    tpu.vector_store %arg12[%c0_157, %c24_158], %452 {strides = array<i32>} : memref<16x32xbf16, #tpu.memory_space<vmem>>, vector<16x8xbf16>,
    %c0_159 = arith.constant 0 : index
    %c0_160 = arith.constant 0 : index
    %454 = vector.load %arg12[%c0_159, %c0_160] : memref<16x32xbf16, #tpu.memory_space<vmem>>, vector<16x32xbf16>
    %c0_161 = arith.constant 0 : index
    %c0_162 = arith.constant 0 : index
    %455 = vector.load %arg7[%c0_161, %c0_162] : memref<32x32xbf16, #tpu.memory_space<vmem>>, vector<32x32xbf16>
    %cst_163 = arith.constant dense<0.000000e+00> : vector<16x32xf32>
    %456 = tpu.matmul %454, %455, %cst_163 {dimension_numbers = #tpu.dot_dimension_numbers<[1], [0], [0], [1], [0, 0, 1, 1], [], []>} : vector<16x32xbf16>, vector<32x32xbf16>, vector<16x32xf32> -> vector<16x32xf32>
    %457 = arith.addf %456, %1 : vector<16x32xf32>
    %cst_164 = arith.constant dense<0.000000e+00> : vector<16xf32>
    %458 = vector.multi_reduction <add>, %457, %cst_164 [1] : vector<16x32xf32> to vector<16xf32>
    %459 = vector.shape_cast %458 : vector<16xf32> to vector<16x1xf32>
    %cst_165 = arith.constant 3.200000e+01 : f32
    %460 = vector.broadcast %cst_165 : f32 to vector<16x1xf32>
    %461 = arith.divf %459, %460 : vector<16x1xf32>
    %462 = vector.broadcast %461 : vector<16x1xf32> to vector<16x32xf32>
    %463 = arith.subf %457, %462 : vector<16x32xf32>
    %464 = arith.mulf %463, %463 : vector<16x32xf32>
    %cst_166 = arith.constant dense<0.000000e+00> : vector<16xf32>
    %465 = vector.multi_reduction <add>, %464, %cst_166 [1] : vector<16x32xf32> to vector<16xf32>
    %466 = vector.shape_cast %465 : vector<16xf32> to vector<16x1xf32>
    %cst_167 = arith.constant 3.200000e+01 : f32
    %467 = vector.broadcast %cst_167 : f32 to vector<16x1xf32>
    %468 = arith.divf %466, %467 : vector<16x1xf32>
    %469 = vector.broadcast %461 : vector<16x1xf32> to vector<16x32xf32>
    %470 = arith.subf %457, %469 : vector<16x32xf32>
    %cst_168 = arith.constant 9.99999997E-7 : f32
    %471 = vector.broadcast %cst_168 : f32 to vector<16x1xf32>
    %472 = arith.addf %468, %471 : vector<16x1xf32>
    %473 = math.rsqrt %472 : vector<16x1xf32>
    %474 = vector.broadcast %473 : vector<16x1xf32> to vector<16x32xf32>
    %475 = arith.mulf %470, %474 : vector<16x32xf32>
    %c0_169 = arith.constant 0 : index
    %c0_170 = arith.constant 0 : index
    %476 = vector.load %arg8[%c0_169, %c0_170] : memref<1x32xf32, #tpu.memory_space<vmem>>, vector<1x32xf32>
    %477 = vector.broadcast %476 : vector<1x32xf32> to vector<16x32xf32>
    %478 = arith.mulf %475, %477 : vector<16x32xf32>
    %c0_171 = arith.constant 0 : index
    %c0_172 = arith.constant 0 : index
    %479 = vector.load %arg9[%c0_171, %c0_172] : memref<1x32xf32, #tpu.memory_space<vmem>>, vector<1x32xf32>
    %480 = vector.broadcast %479 : vector<1x32xf32> to vector<16x32xf32>
    %481 = arith.addf %478, %480 : vector<16x32xf32>
    %c0_173 = arith.constant 0 : index
    %c0_174 = arith.constant 0 : index
    %c0_175 = arith.constant 0 : index
    %482 = vector.load %arg10[%c0_173, %c0_174, %c0_175] : memref<1x16x32xf32, #tpu.memory_space<vmem>>, vector<1x16x32xf32>
    %483 = vector.shape_cast %482 : vector<1x16x32xf32> to vector<16x32xf32>
    %484 = vector.shape_cast %481 : vector<16x32xf32> to vector<1x16x32xf32>
    tpu.vector_store %arg10[%c0_173, %c0_174, %c0_175], %484 {strides = array<i32>} : memref<1x16x32xf32, #tpu.memory_space<vmem>>, vector<1x16x32xf32>,
    return
  }
  func.func @transform_0(%arg0: i32) -> (i32, i32, i32) {
    %c0_i32 = arith.constant 0 : i32
    %c0_i32_0 = arith.constant 0 : i32
    %c0_i32_1 = arith.constant 0 : i32
    return %arg0, %c0_i32, %c0_i32_0 : i32, i32, i32
  }
  func.func @transform_1(%arg0: i32) -> (i32, i32) {
    %c0_i32 = arith.constant 0 : i32
    %c0_i32_0 = arith.constant 0 : i32
    %c0_i32_1 = arith.constant 0 : i32
    return %c0_i32, %c0_i32_0 : i32, i32
  }
  func.func @transform_2(%arg0: i32) -> (i32, i32) {
    %c0_i32 = arith.constant 0 : i32
    %c0_i32_0 = arith.constant 0 : i32
    %c0_i32_1 = arith.constant 0 : i32
    return %c0_i32, %c0_i32_0 : i32, i32
  }
  func.func @transform_3(%arg0: i32) -> (i32, i32) {
    %c0_i32 = arith.constant 0 : i32
    %c0_i32_0 = arith.constant 0 : i32
    %c0_i32_1 = arith.constant 0 : i32
    return %c0_i32, %c0_i32_0 : i32, i32
  }
  func.func @transform_4(%arg0: i32) -> (i32, i32) {
    %c0_i32 = arith.constant 0 : i32
    %c0_i32_0 = arith.constant 0 : i32
    %c0_i32_1 = arith.constant 0 : i32
    return %c0_i32, %c0_i32_0 : i32, i32
  }
  func.func @transform_5(%arg0: i32) -> (i32, i32) {
    %c0_i32 = arith.constant 0 : i32
    %c0_i32_0 = arith.constant 0 : i32
    %c0_i32_1 = arith.constant 0 : i32
    return %c0_i32, %c0_i32_0 : i32, i32
  }
  func.func @transform_6(%arg0: i32) -> (i32, i32) {
    %c0_i32 = arith.constant 0 : i32
    %c0_i32_0 = arith.constant 0 : i32
    %c0_i32_1 = arith.constant 0 : i32
    return %c0_i32, %c0_i32_0 : i32, i32
  }
  func.func @transform_7(%arg0: i32) -> (i32, i32) {
    %c0_i32 = arith.constant 0 : i32
    %c0_i32_0 = arith.constant 0 : i32
    %c0_i32_1 = arith.constant 0 : i32
    return %c0_i32, %c0_i32_0 : i32, i32
  }
  func.func @transform_8(%arg0: i32) -> (i32, i32) {
    %c0_i32 = arith.constant 0 : i32
    %c0_i32_0 = arith.constant 0 : i32
    %c0_i32_1 = arith.constant 0 : i32
    return %c0_i32, %c0_i32_0 : i32, i32
  }
  func.func @transform_9(%arg0: i32) -> (i32, i32, i32) {
    %c0_i32 = arith.constant 0 : i32
    %c0_i32_0 = arith.constant 0 : i32
    %c0_i32_1 = arith.constant 0 : i32
    return %arg0, %c0_i32, %c0_i32_0 : i32, i32, i32
  }
}

</mosaic_0001>

<bundles_post_ra>
// kernel: fast_self_attention_dec.1
= control target key start
LH: loop header
LB: loop body
LE: loop exit
PB: predicated region body
PF: predicated region fallthrough
CT: control target
= control target key end

     0   :  { %14 = vsyncpa [#allocation5], 0  ;;  %s3088_s0 = inlined_call_operand.vmem [shape: f32[2,16,32], index: 0, kind: input, shape index: {}]   ;;  %s3089_s1 = inlined_call_operand.vmem [shape: bf16[32,64], index: 1, kind: input, shape index: {}]   ;;  %s3090_s2 = inlined_call_operand.vmem [shape: f32[1,64], index: 2, kind: input, shape index: {}]   ;;  %s3091_s3 = inlined_call_operand.vmem [shape: bf16[32,120], index: 3, kind: input, shape index: {}]   ;;  %s3092_s4 = inlined_call_operand.vmem [shape: f32[1,120], index: 4, kind: input, shape index: {}]   ;;  %s3093_s5 = inlined_call_operand.vmem [shape: f32[4,15], index: 5, kind: input, shape index: {}]   ;;  %s3094_s6 = inlined_call_operand.vmem [shape: bf16[32,32], index: 6, kind: input, shape index: {}]   ;;  %s3095_s7 = inlined_call_operand.vmem [shape: f32[1,32], index: 7, kind: input, shape index: {}]   ;;  %s3096_s8 = inlined_call_operand.vmem [shape: f32[1,32], index: 8, kind: input, shape index: {}]   ;;  %s3097_s9 = inlined_call_operand.hbm [shape: f32[2,16,32], index: 9, kind: output, shape index: {}]  }
   0x1   :  { %16 = vsyncpa [#allocation5 + $0x1], 0  ;;  %s2337_s30 = smov 0   ;;  %s2339_s10 = smov 0  }
   0x2   :  { %s2341_s11 = smov 0   ;;  %s2343_s12 = smov 0  }
   0x3 LB: > { %s2358_s13 = sadd.s32 4294967295, %s2211_s12   ;;  %s1777_s14 = sadd.s32 4294967294, %s2211_s12   ;;  %s2211_s12 = sphi %s2343_s12, %s3151_s12   ;;  %s2207_s11 = sphi %s2341_s11, %s3150_s11   ;;  %s2203_s10 = sphi %s2339_s10, %s3149_s10   ;;  %s2199_s30 = sphi %s2337_s30, %s3148_s30  }
   0x4   : > { %s2362_s15 = sadd.s32 1, %s2211_s12   ;;  %s223_s16 = sadd.s32 1, %s2207_s11 }
   0x5   : > { %s220_s17 = ssub.s32 %s2211_s12, %s2362_s15  ;;  %p233_p0 = scmp.ne.s32.totalorder %s2207_s11, %s2203_s10 }
   0x6   : > { %p221_p1 = scmp.eq.s32.totalorder %s220_s17, 0  ;;  %p234_p2 = scmp.eq.s32.totalorder %s2358_s13, 1 }
   0x7   : > { %p239_p3 = scmp.ne.s32.totalorder %s2203_s10, %s2199_s30  ;;  %p240_p4 = scmp.eq.s32.totalorder %s1777_s14, 1 }
   0x8   : > { %s2373_s18 = scalar_select %p221_p1, %s2207_s11, %s223_s16  }
   0x9   : > { %p2375_p5 = por %p234_p2, %p233_p0  ;;  %p2379_p6 = por %p240_p4, %p239_p3 }
   0xa   : > { %p1780_p7 = scmp.ge.s32.totalorder %s2211_s12, 1  ;;  %p290_p8 = scmp.lt.s32.totalorder %s2211_s12, 3 }
   0xc   : > { %p291_p9 = pnand %p1780_p7, %p290_p8 }
   0xd   : > { %v2073_v0 = vld [vmem:[%s3089_s1] sm:$0xff] (!%p291_p9)   ;;  %v3098_v1 = vmov (!%p291_p9), 0.0   ;;  %v2074_v2 = vld [vmem:[%s3089_s1 + $0x8] sm:$0xff] (!%p291_p9)   ;;  %vm2214_vm0 = vmmov (!%p291_p9), 0   ;;  %p326_p10 = scmp.lt.s32.totalorder (!%p291_p9), %s2358_s13, 1  ;;  %vm358_vm1 = vcmask (!%p291_p9), 261120   ;;  %v520_v21 = vlaneseq (!%p291_p9) }
   0xe   : > { %294 = sbr.rel (%p291_p9) target bundleno = 2254 (0x8ce), region = 56  ;;  %1817 = vmatprep.subr.bf16.mxu0 (!%p291_p9), %v3098_v1  ;;  %1825 = vmatprep.subr.bf16.mxu1 (!%p291_p9), %v3098_v1  ;;  %493 = vst.msk [vmem:[#allocation2] sm:$0xff] (!%p291_p9), %vm358_vm1, %v3098_v1  ;;  %494 = vst.msk [vmem:[#allocation2 + $0x8] sm:$0xff] (!%p291_p9), %vm358_vm1, %v3098_v1  ;;  %v1784_v6 = vld [vmem:[%s3090_s2] ss:$0 sm:$0xff] (!%p291_p9)  ;;  %v2076_v20 = vld [vmem:[%s3091_s3 + $0x8] sm:$0xff] (!%p291_p9)  }
   0xf   : > { %1818 = vmatpush3.bf16.msra.mxu0 (!%p291_p9), %v2073_v0  ;;  %1821 = vmatprep.mubr.msk.bf16.mxu0 (!%p291_p9), %vm2214_vm0, %v3098_v1  ;;  %v2075_v16 = vld [vmem:[%s3091_s3] sm:$0xff] (!%p291_p9)   ;;  %v521_v22 = vshrl.u32 (!%p291_p9), %v520_v21, 7  ;;  %s2216_s27 = smov (!%p291_p9), 45   ;;  %s2217_s28 = smov (!%p291_p9), 105   ;;  %vm799_vm2 = vcmask (!%p291_p9), 490856   ;;  %vm530_vm3 = vcmask (!%p291_p9), 244856  }
  0x10   : > { %1819 = vmatprep.subr.bf16.mxu0 (!%p291_p9), %v3098_v1  ;;  %1829 = vmatprep.mubr.msk.bf16.mxu1 (!%p291_p9), %vm2214_vm0, %v3098_v1  ;;  %v497_v23 = vld [vmem:[%s3093_s5] sm:$0xf] (!%p291_p9)  ;;  %s2218_s14 = smov (!%p291_p9), 15   ;;  %s2219_s16 = smov (!%p291_p9), 75   ;;  %vm1067_vm4 = vcmask (!%p291_p9), 736856   ;;  %vm1335_vm5 = vcmask (!%p291_p9), 982856  }
  0x11   : > { %1826 = vmatpush3.bf16.msra.mxu1 (!%p291_p9), %v2075_v16  ;;  %v791_v25 = vsub.s32 (!%p291_p9), 1, %v521_v22  ;;  %v1327_v26 = vsub.s32 (!%p291_p9), 3, %v521_v22  ;;  %v522_v35 = vsub.s32 (!%p291_p9), 0, %v521_v22  ;;  %v1059_v37 = vsub.s32 (!%p291_p9), 2, %v521_v22  ;;  %v1790_v39 = vld [vmem:[%s3092_s4] ss:$0 sm:$0xff] (!%p291_p9) }
  0x12   : > { %1827 = vmatprep.subr.bf16.mxu1 (!%p291_p9), %v3098_v1  ;;  %s2220_s22 = smov (!%p291_p9), 83   ;;  %s2221_s23 = smov (!%p291_p9), 113   ;;  %vm553_vm6 = vcmask (!%p291_p9), 121856   ;;  %vm787_vm7 = vcmask (!%p291_p9), 64512   ;;  %vm1055_vm8 = vcmask (!%p291_p9), 130112   ;;  %vm1323_vm9 = vcmask (!%p291_p9), 195712  }
  0x13   : > { %1820 = vmatpush3.bf16.msra.mxu0 (!%p291_p9), %v2074_v2  ;;  %v792_v27 = vrot.slane (!%p291_p9), %v497_v23, %v791_v25  ;;  %v1328_v29 = vrot.slane (!%p291_p9), %v497_v23, %v1327_v26  ;;  %v523_v36 = vrot.slane (!%p291_p9), %v497_v23, %v522_v35  ;;  %v1060_v38 = vrot.slane (!%p291_p9), %v497_v23, %v1059_v37  ;;  %s2222_s24 = smov (!%p291_p9), 53   ;;  %s2284_s17 = smov (!%p291_p9), [#allocation4]  }
  0x14   : > { %1833 = vmatprep.subr.bf16.mxu0 (!%p291_p9), %v3098_v1  ;;  %vm1591_vm10 = vcmask (!%p291_p9), 261312   ;;  %s2153_s21 = sshll.u32 (!%p291_p9), %s2284_s17, 4  ;;  %s2154_s21 = int_to_ptr.vmem [resolvable:$false] %s2153_s21 }
  0x15   : > { %s327_s25 = scalar_select %p326_p10, %s2358_s13, 1  ;;  %1828 = vmatpush3.bf16.msra.mxu1 %v2076_v20  ;;  %794 = vrot.lane.b32.xlu1 %v792_v27, %s2216_s27 }
  0x17   : > { %s1806_s26 = sshll.u32 %s327_s25, 4  ;;  %s2223_s25 = smov 23  }
  0x18   : > { %s2407_s29 = scalar_lea.vmem %s3088_s0, %s1806_s26  ;;  %s2215_s26 = smov 96  }
  0x19   : > { %v332_v3 = vld [vmem:[%s2407_s29] sm:$0xff]  ;;  %v333_v4 = vld [vmem:[%s2407_s29 + $0x8] sm:$0xff]  ;;  %1330 = vrot.lane.b32.xlu1 %v1328_v29, %s2217_s28 }
  0x1a   : > { %v334_v5 = vpack.c.bf16 %v333_v4, %v332_v3 }
  0x1c   : > { %1822 = vmatmul.mubr.msk.bf16.vlgmr.msra.gmra.mrb[0].mxu0 %vm358_vm1, %v334_v5 }
  0x1d   : > { %1837 = vmatprep.mubr.msk.bf16.mxu0 %vm2214_vm0, %v3098_v1 }
  0x87   : > { %v795_v51 = vpop.permute.xlu1 %794 }
  0x8b   : > { %v1331_v53 = vpop.permute.xlu1 %1330 }
  0xef   : > { %v396_v7 = vpop.f32.mrb[0].mxu0 }
  0xf0   : > { %v397_v8 = vadd.f32 %v1784_v6, %v396_v7  ;;  %v1823_v9 = vpop.f32.mrb[1].mxu0 }
  0xf1   : > { %v399_v10 = vpop.f32.mrb[2].mxu0 }
  0xf2   : > { %v1788_v11 = vmul.f32 -1.442695, %v397_v8  ;;  %v400_v12 = vadd.f32 %v1784_v6, %v399_v10  ;;  %v1824_v13 = vpop.f32.mrb[3].mxu0 }
  0xf4   : > { %2079 = vpow2.f32 %v1788_v11  ;;  %v1789_v14 = vmul.f32 -1.442695, %v400_v12 }
  0xf6   : > { %2081 = vpow2.f32 %v1789_v14 }
  0xfe   : > { %v2080_v15 = vpop.eup %2079 }
  0xff   : > { %v409_v17 = vadd.f32 1.0, %v2080_v15 }
 0x100   : > { %v2082_v18 = vpop.eup %2081 }
 0x101   : > { %2083 = vrcp.f32 %v409_v17  ;;  %v410_v19 = vadd.f32 1.0, %v2082_v18 }
 0x103   : > { %2085 = vrcp.f32 %v410_v19 }
 0x10b   : > { %v2084_v24 = vpop.eup %2083 }
 0x10c   : > { %417 = vrot.lane.b32.xlu0 %v2084_v24, %s2215_s26 }
 0x10d   : > { %v2086_v28 = vpop.eup %2085 }
 0x110   : > { %419 = vrot.lane.b32.xlu0 %v2086_v28, %s2215_s26 }
 0x114   : > { %525 = vrot.lane.b32.xlu0 %v523_v36, %s2218_s14 }
 0x118   : > { %1062 = vrot.lane.b32.xlu0 %v1060_v38, %s2219_s16 }
 0x17e   : > { %v418_v30 = vpop.permute.xlu0 %417 }
 0x17f   : > { %v423_v31 = vmul.f32 %v418_v30, %v397_v8 }
 0x181   : > { %495 = vst.msk [vmem:[#allocation2 + $0x10] sm:$0xff] %vm358_vm1, %v423_v31 }
 0x182   : > { %v420_v32 = vpop.permute.xlu0 %419 }
 0x183   : > { %v424_v33 = vmul.f32 %v420_v32, %v400_v12 }
 0x185   : > { %v425_v34 = vpack.c.bf16 %v424_v33, %v423_v31  ;;  %496 = vst.msk [vmem:[#allocation2 + $0x18] sm:$0xff] %vm358_vm1, %v424_v33 }
 0x186   : > { %v526_v54 = vpop.permute.xlu0 %525 }
 0x187   : > { %1830 = vmatmul.mubr.msk.bf16.vlgmr.msra.gmra.mrb[0].mxu1 %vm358_vm1, %v425_v34 }
 0x18a   : > { %v1063_v58 = vpop.permute.xlu0 %1062 }
 0x25a   : > { %v486_v40 = vpop.f32.mrb[0].mxu1 }
 0x25b   : > { %v487_v41 = vadd.f32 %v1790_v39, %v486_v40  ;;  %v1831_v42 = vpop.f32.mrb[1].mxu1 }
 0x25c   : > { %v489_v43 = vpop.f32.mrb[2].mxu1 }
 0x25d   : > { %512 = vrot.lane.b32.xlu1 %v487_v41, %s2218_s14  ;;  %v1832_v44 = vpop.f32.mrb[3].mxu1  ;;  %v490_v45 = vadd.f32 %v1790_v39, %v489_v43  ;;  %v1794_v46 = vmul.f32 -1.442695, %v487_v41 }
 0x25f   : > { %2087 = vpow2.f32 %v1794_v46  ;;  %v1795_v47 = vmul.f32 -1.442695, %v490_v45 }
 0x261   : > { %514 = vrot.lane.b32.xlu1 %v490_v45, %s2218_s14  ;;  %2089 = vpow2.f32 %v1795_v47 }
 0x269   : > { %v2088_v48 = vpop.eup %2087 }
 0x26a   : > { %v504_v49 = vadd.f32 1.0, %v2088_v48 }
 0x26b   : > { %v2090_v50 = vpop.eup %2089 }
 0x26c   : > { %2091 = vrcp.f32 %v504_v49  ;;  %v505_v52 = vadd.f32 1.0, %v2090_v50 }
 0x26e   : > { %2093 = vrcp.f32 %v505_v52 }
 0x276   : > { %v2092_v55 = vpop.eup %2091 }
 0x278   : > { %v2094_v61 = vpop.eup %2093 }
 0x2cf   : > { %v513_v56 = vpop.permute.xlu1 %512 }
 0x2d0   : > { %v518_v57 = vmul.f32 %v2092_v55, %v513_v56 }
 0x2d2   : > { %v797_v59 = vadd.f32 %v795_v51, %v518_v57  ;;  %v528_v60 = vadd.f32 %v526_v54, %v518_v57  ;;  %v1065_v3 = vadd.f32 %v1063_v58, %v518_v57  ;;  %v1333_v8 = vadd.f32 %v1331_v53, %v518_v57 }
 0x2d3   : > { %v515_v62 = vpop.permute.xlu1 %514 }
 0x2d4   : > { %v519_v63 = vmul.f32 %v2094_v61, %v515_v62  ;;  %v800_v0 = vsel %vm799_vm2, %v797_v59, -inf  ;;  %v531_v2 = vsel %vm530_vm3, %v528_v60, -inf  ;;  %v1068_v6 = vsel %vm1067_vm4, %v1065_v3, -inf }
 0x2d5   : > { %801 = vmax.xlane.f32.xlu1 %v800_v0  ;;  %532 = vmax.xlane.f32.xlu0 %v531_v2  ;;  %v1336_v10 = vsel %vm1335_vm5, %v1333_v8, -inf }
 0x2d6   : > { %v529_v4 = vadd.f32 %v526_v54, %v519_v63  ;;  %v1066_v7 = vadd.f32 %v1063_v58, %v519_v63  ;;  %v1334_v11 = vadd.f32 %v1331_v53, %v519_v63  ;;  %v798_v12 = vadd.f32 %v795_v51, %v519_v63 }
 0x2d8   : > { %v534_v5 = vsel %vm530_vm3, %v529_v4, -inf  ;;  %v1071_v9 = vsel %vm1067_vm4, %v1066_v7, -inf  ;;  %v1339_v13 = vsel %vm1335_vm5, %v1334_v11, -inf  ;;  %v803_v14 = vsel %vm799_vm2, %v798_v12, -inf }
 0x2d9   : > { %535 = vmax.xlane.f32.xlu1 %v534_v5  ;;  %1069 = vmax.xlane.f32.xlu0 %v1068_v6 }
 0x2dd   : > { %1072 = vmax.xlane.f32.xlu1 %v1071_v9  ;;  %1337 = vmax.xlane.f32.xlu0 %v1336_v10  ;;  %v2225_v9 = vmov 15  }
 0x2de   : > { %1953 = vset.pattern.permute.xlu1 %v2225_v9 }
 0x2e1   : > { %1340 = vmax.xlane.f32.xlu1 %v1339_v13  ;;  %804 = vmax.xlane.f32.xlu0 %v803_v14 }
 0x362   : > { %v2436_v15 = vpop.xlane.xlu1 %801  ;;  %v2438_v16 = vpop.xlane.xlu0 %532 }
 0x363   : > { %v806_v17 = vmax.f32 %v2436_v15, -10000.0  ;;  %v537_v18 = vmax.f32 %v2438_v16, -10000.0 }
 0x365   : > { %v808_v19 = vsub.f32 %v797_v59, %v806_v17  ;;  %v539_v20 = vsub.f32 %v528_v60, %v537_v18  ;;  %v560_v10 = vsub.f32 -10000.0, %v537_v18 }
 0x366   : > { %v2446_v21 = vpop.xlane.xlu1 %535  ;;  %v2448_v22 = vpop.xlane.xlu0 %1069 }
 0x367   : > { %v810_v23 = vmul.f32 1.442695, %v808_v19  ;;  %v541_v24 = vmul.f32 1.442695, %v539_v20  ;;  %v1074_v25 = vmax.f32 %v2448_v22, -10000.0  ;;  %v538_v28 = vmax.f32 %v2446_v21, -10000.0 }
 0x368   : > { %v2250_v21 = vmov 76  }
 0x369   : > { %2095 = vpow2.f32 %v810_v23  ;;  %v1076_v26 = vsub.f32 %v1065_v3, %v1074_v25  ;;  %v540_v34 = vsub.f32 %v529_v4, %v538_v28  ;;  %v1096_v19 = vsub.f32 -10000.0, %v1074_v25 }
 0x36a   : > { %v2453_v27 = vpop.xlane.xlu0 %1337  ;;  %2097 = vpow2.f32 %v541_v24  ;;  %v2456_v29 = vpop.xlane.xlu1 %1072 }
 0x36b   : > { %v1342_v30 = vmax.f32 %v2453_v27, -10000.0  ;;  %v1078_v31 = vmul.f32 1.442695, %v1076_v26  ;;  %v1075_v35 = vmax.f32 %v2456_v29, -10000.0  ;;  %v543_v41 = vmul.f32 1.442695, %v540_v34 }
 0x36c   : > { %v1098_v26 = vmul.f32 1.442695, %v1096_v19  ;;  %v2240_v27 = vmov 25  }
 0x36d   : > { %v1344_v32 = vsub.f32 %v1333_v8, %v1342_v30  ;;  %2099 = vpow2.f32 %v1078_v31  ;;  %v1077_v42 = vsub.f32 %v1066_v7, %v1075_v35  ;;  %v2224_v8 = vmov 20  }
 0x36e   : > { %v2461_v33 = vpop.xlane.xlu0 %804  ;;  %v2467_v38 = vpop.xlane.xlu1 %1340  ;;  %1958 = vset.pattern.permute.xlu0 %v2224_v8 }
 0x36f   : > { %v1346_v36 = vmul.f32 1.442695, %v1344_v32  ;;  %v807_v37 = vmax.f32 %v2461_v33, -10000.0  ;;  %v1343_v43 = vmax.f32 %v2467_v38, -10000.0  ;;  %v1080_v46 = vmul.f32 1.442695, %v1077_v42 }
 0x370   : > { %v2228_v42 = vmov 26   ;;  %v3101_v38 = vmov 87  }
 0x371   : > { %v809_v39 = vsub.f32 %v798_v12, %v807_v37  ;;  %2101 = vpow2.f32 %v1346_v36  ;;  %v1345_v47 = vsub.f32 %v1334_v11, %v1343_v43  ;;  %v562_v11 = vmul.f32 1.442695, %v560_v10 }
 0x372   : > { %2103 = vpow2.f32 %v543_v41  ;;  %v828_v12 = vsub.f32 -10000.0, %v806_v17  ;;  %v2226_v36 = vmov 23   ;;  %v3114_v10 = vmov 81  }
 0x373   : > { %v2471_v40 = vpop.eup %2095  ;;  %v812_v44 = vmul.f32 1.442695, %v809_v39  ;;  %v1348_v49 = vmul.f32 1.442695, %v1345_v47  ;;  %v2227_v39 = vmov 16  }
 0x374   : > { %816 = vrot.lane.b32.xlu1 %v2471_v40, %s2220_s22  ;;  %v2477_v45 = vpop.eup %2097  ;;  %v830_v14 = vmul.f32 1.442695, %v828_v12  ;;  %v561_v12 = vsub.f32 -10000.0, %v538_v28  ;;  %v3105_v28 = vmov 84  }
 0x375   : > { %547 = vrot.lane.b32.xlu0 %v2477_v45, %s2221_s23  ;;  %2105 = vpow2.f32 %v812_v44  ;;  %v2229_v44 = vmov 17  }
 0x376   : > { %2107 = vpow2.f32 %v1080_v46  ;;  %v2231_v46 = vmov 18   ;;  %v564_v19 = vmul.f32 1.442695, %v561_v12 }
 0x377   : > { %v2482_v48 = vpop.eup %2099  ;;  %2109 = vpow2.f32 %v1348_v49 }
 0x378   : > { %1084 = vrot.lane.b32.xlu1 %v2482_v48, %s2222_s24  ;;  %2111 = vpow2.f32 %v562_v11 }
 0x379   : > { %2113 = vpow2.f32 %v830_v14  ;;  %v3110_v14 = vmov 82  }
 0x37b   : > { %v2485_v50 = vpop.eup %2101 }
 0x37c   : > { %1352 = vrot.lane.b32.xlu1 %v2485_v50, %s2223_s25  ;;  %v2488_v51 = vpop.eup %2103 }
 0x37f   : > { %v2490_v52 = vpop.eup %2105 }
 0x380   : > { %549 = vrot.lane.b32.xlu1 %v2488_v51, %s2221_s23  ;;  %818 = vrot.lane.b32.xlu0 %v2490_v52, %s2220_s22  ;;  %v2494_v53 = vpop.eup %2107  ;;  %s2155_s22 = scalar_lea.vmem %s2154_s21, 512 }
 0x381   : > { %v2497_v54 = vpop.eup %2109 }
 0x382   : > { %v2112_v13 = vpop.eup %2111 }
 0x383   : > { %v566_v20 = vmul.f32 15.0, %v2112_v13  ;;  %v2114_v31 = vpop.eup %2113  ;;  %v2246_v13 = vmov 45  }
 0x384   : > { %1086 = vrot.lane.b32.xlu0 %v2494_v53, %s2222_s24  ;;  %v834_v15 = vmul.f32 15.0, %v2114_v31  ;;  %s1807_s24 = sshll.u32 %s2358_s13, 8 }
 0x385   : > { %s3041_s14 = scalar_lea.hbm %s3097_s9, %s1807_s24 }
 0x388   : > { %1354 = vrot.lane.b32.xlu0 %v2497_v54, %s2223_s25 }
 0x3e6   : > { %v817_v55 = vpop.permute.xlu1 %816 }
 0x3e7   : > { %v822_v56 = vsel %vm553_vm6, %v817_v55, 0.0  ;;  %v548_v57 = vpop.permute.xlu0 %547  ;;  %v2232_v55 = vmov 46  }
 0x3e8   : > { %823 = vadd.xlane.f32.xlu1 %v822_v56  ;;  %v554_v58 = vsel %vm553_vm6, %v548_v57, 0.0  ;;  %v2233_v56 = vmov 19  }
 0x3e9   : > { %555 = vadd.xlane.f32.xlu0 %v554_v58 }
 0x3ea   : > { %v1085_v59 = vpop.permute.xlu1 %1084 }
 0x3eb   : > { %v1090_v60 = vsel %vm553_vm6, %v1085_v59, 0.0  ;;  %v2234_v59 = vmov 75  }
 0x3ed   : > { %1091 = vadd.xlane.f32.xlu0 %v1090_v60  ;;  %v2235_v60 = vmov 21  }
 0x3ee   : > { %v1353_v61 = vpop.permute.xlu1 %1352 }
 0x3ef   : > { %v1358_v62 = vsel %vm553_vm6, %v1353_v61, 0.0  ;;  %v2236_v61 = vmov 22  }
 0x3f1   : > { %1359 = vadd.xlane.f32.xlu0 %v1358_v62  ;;  %v2237_v62 = vmov 77  }
 0x3f2   : > { %v550_v63 = vpop.permute.xlu1 %549  ;;  %v819_v0 = vpop.permute.xlu0 %818 }
 0x3f3   : > { %v557_v2 = vsel %vm553_vm6, %v550_v63, 0.0  ;;  %v825_v4 = vsel %vm553_vm6, %v819_v0, 0.0  ;;  %v2238_v63 = vmov 24   ;;  %v2239_v0 = vmov 78  }
 0x3f5   : > { %558 = vadd.xlane.f32.xlu0 %v557_v2  ;;  %v2242_v2 = vmov 28  }
 0x3f6   : > { %v1087_v3 = vpop.permute.xlu0 %1086 }
 0x3f7   : > { %v1093_v5 = vsel %vm553_vm6, %v1087_v3, 0.0  ;;  %v3117_v3 = vmov 80  }
 0x3f8   : > { %1094 = vadd.xlane.f32.xlu1 %v1093_v5 }
 0x3f9   : > { %826 = vadd.xlane.f32.xlu0 %v825_v4 }
 0x3fa   : > { %v1355_v6 = vpop.permute.xlu0 %1354 }
 0x3fb   : > { %v1361_v7 = vsel %vm553_vm6, %v1355_v6, 0.0 }
 0x3fc   : > { %1362 = vadd.xlane.f32.xlu1 %v1361_v7  ;;  %v2244_v7 = vmov 29  }
 0x475   : > { %v824_v18 = vpop.xlane.xlu1 %823 }
 0x476   : > { %v556_v23 = vpop.xlane.xlu0 %555  ;;  %v836_v22 = vadd.f32 %v834_v15, %v824_v18  ;;  %v3103_v18 = vmov 85  }
 0x477   : > { %v568_v24 = vadd.f32 %v566_v20, %v556_v23  ;;  %v2248_v20 = vmov 47   ;;  %v3108_v23 = vmov 83  }
 0x479   : > { %2115 = vrcp.f32 %v568_v24 }
 0x47a   : > { %2117 = vpow2.f32 %v1098_v26  ;;  %v1092_v25 = vpop.xlane.xlu0 %1091  ;;  %v1097_v26 = vsub.f32 -10000.0, %v1075_v35 }
 0x47b   : > { %2119 = vrcp.f32 %v836_v22  ;;  %v3102_v22 = vmov 86  }
 0x47c   : > { %v1100_v15 = vmul.f32 1.442695, %v1097_v26 }
 0x47e   : > { %v1360_v5 = vpop.xlane.xlu0 %1359 }
 0x482   : > { %v559_v29 = vpop.xlane.xlu0 %558 }
 0x483   : > { %v2116_v16 = vpop.eup %2115 }
 0x484   : > { %v2517_v32 = vmul.f32 %v2116_v16, %v2477_v45  ;;  %v2118_v17 = vpop.eup %2117  ;;  %v2230_v45 = vmov 27   ;;  %v2252_v16 = vmov 105  }
 0x485   : > { %v1102_v34 = vmul.f32 15.0, %v2118_v17  ;;  %v2120_v47 = vpop.eup %2119  ;;  %v1365_v17 = vsub.f32 -10000.0, %v1343_v43  ;;  %v2257_v43 = vmov 48  }
 0x486   : > { %649 = vperm.xlu0 %1958, %v2517_v32   ;;  %578 = vperm.xlu1 %1953, %v2517_v32   ;;  %v2534_v49 = vmul.f32 %v2120_v47, %v2471_v40  ;;  %v1364_v40 = vsub.f32 -10000.0, %v1342_v30  ;;  %v3119_v30 = vmov 79  }
 0x487   : > { %v1104_v41 = vadd.f32 %v1102_v34, %v1092_v25  ;;  %v1368_v34 = vmul.f32 1.442695, %v1365_v17  ;;  %v827_v17 = vpop.xlane.xlu0 %826 }
 0x489   : > { %2121 = vrcp.f32 %v1104_v41  ;;  %v829_v41 = vsub.f32 -10000.0, %v807_v37  ;;  %v1095_v37 = vpop.xlane.xlu1 %1094 }
 0x48a   : > { %1961 = vset.pattern.permute.xlu0 %v2226_v36  ;;  %1954 = vset.pattern.permute.xlu1 %v2227_v39 }
 0x48b   : > { %691 = vperm.xlu0 %1961, %v2517_v32   ;;  %593 = vperm.xlu1 %1954, %v2517_v32   ;;  %v832_v47 = vmul.f32 1.442695, %v829_v41 }
 0x48f   : > { %1964 = vset.pattern.permute.xlu0 %v2228_v42  ;;  %1955 = vset.pattern.permute.xlu1 %v2229_v44 }
 0x490   : > { %733 = vperm.xlu0 %1964, %v2517_v32   ;;  %607 = vperm.xlu1 %1955, %v2517_v32  }
 0x493   : > { %v2122_v57 = vpop.eup %2121 }
 0x494   : > { %1965 = vset.pattern.permute.xlu0 %v2230_v45  ;;  %1956 = vset.pattern.permute.xlu1 %v2231_v46  ;;  %v2541_v58 = vmul.f32 %v2122_v57, %v2482_v48  ;;  %v1366_v48 = vmul.f32 1.442695, %v1364_v40  ;;  %v3100_v57 = vmov 88   ;;  %v2259_v40 = vmov 107  }
 0x495   : > { %747 = vperm.xlu0 %1965, %v2517_v32   ;;  %621 = vperm.xlu1 %1956, %v2517_v32  }
 0x496   : > { %2123 = vpow2.f32 %v1366_v48 }
 0x499   : > { %1969 = vset.pattern.permute.xlu0 %v2232_v55  ;;  %1957 = vset.pattern.permute.xlu1 %v2233_v56 }
 0x49a   : > { %861 = vperm.xlu0 %1969, %v2534_v49   ;;  %635 = vperm.xlu1 %1957, %v2517_v32  }
 0x49e   : > { %1971 = vset.pattern.permute.xlu0 %v2234_v59  ;;  %1959 = vset.pattern.permute.xlu1 %v2235_v60 }
 0x49f   : > { %663 = vperm.xlu1 %1959, %v2517_v32   ;;  %1114 = vperm.xlu0 %1971, %v2541_v58  }
 0x4a0   : > { %v2124_v4 = vpop.eup %2123 }
 0x4a1   : > { %v1370_v6 = vmul.f32 15.0, %v2124_v4  ;;  %v3099_v4 = vmov 89  }
 0x4a3   : > { %1960 = vset.pattern.permute.xlu1 %v2236_v61  ;;  %1975 = vset.pattern.permute.xlu0 %v2237_v62  ;;  %v1372_v11 = vadd.f32 %v1370_v6, %v1360_v5  ;;  %v2261_v5 = vmov 49  }
 0x4a4   : > { %677 = vperm.xlu1 %1960, %v2517_v32   ;;  %1143 = vperm.xlu0 %1975, %v2541_v58  }
 0x4a5   : > { %2125 = vrcp.f32 %v1372_v11 }
 0x4a6   : > { %2127 = vpow2.f32 %v564_v19 }
 0x4a7   : > { %2129 = vpow2.f32 %v1100_v15 }
 0x4a8   : > { %1962 = vset.pattern.permute.xlu1 %v2238_v63  ;;  %1978 = vset.pattern.permute.xlu0 %v2239_v0 }
 0x4a9   : > { %705 = vperm.xlu1 %1962, %v2517_v32   ;;  %1157 = vperm.xlu0 %1978, %v2541_v58  }
 0x4ad   : > { %1963 = vset.pattern.permute.xlu1 %v2240_v27  ;;  %1981 = vset.pattern.permute.xlu0 %v3119_v30 }
 0x4ae   : > { %719 = vperm.xlu1 %1963, %v2517_v32   ;;  %1171 = vperm.xlu0 %1981, %v2541_v58  }
 0x4af   : > { %v2126_v24 = vpop.eup %2125 }
 0x4b0   : > { %v2586_v31 = vmul.f32 %v2126_v24, %v2485_v50  ;;  %v2255_v50 = vmov 106   ;;  %v1363_v24 = vpop.xlane.xlu1 %1362 }
 0x4b2   : > { %1966 = vset.pattern.permute.xlu1 %v2242_v2  ;;  %1984 = vset.pattern.permute.xlu0 %v3117_v3 }
 0x4b3   : > { %761 = vperm.xlu1 %1966, %v2517_v32   ;;  %1185 = vperm.xlu0 %1984, %v2541_v58  }
 0x4b7   : > { %1967 = vset.pattern.permute.xlu1 %v2244_v7  ;;  %1987 = vset.pattern.permute.xlu0 %v3114_v10 }
 0x4b8   : > { %775 = vperm.xlu1 %1967, %v2517_v32   ;;  %1199 = vperm.xlu0 %1987, %v2541_v58   ;;  %v2128_v32 = vpop.eup %2127 }
 0x4b9   : > { %v567_v35 = vmul.f32 15.0, %v2128_v32  ;;  %v2130_v33 = vpop.eup %2129  ;;  %v3120_v32 = vmov 108  }
 0x4ba   : > { %v1103_v48 = vmul.f32 15.0, %v2130_v33 }
 0x4bb   : > { %v569_v25 = vadd.f32 %v567_v35, %v559_v29  ;;  %v2263_v35 = vmov 50  }
 0x4bc   : > { %1968 = vset.pattern.permute.xlu1 %v2246_v13  ;;  %1990 = vset.pattern.permute.xlu0 %v3110_v14  ;;  %v1105_v12 = vadd.f32 %v1103_v48, %v1095_v37  ;;  %v3111_v14 = vmov 116  }
 0x4bd   : > { %846 = vperm.xlu1 %1968, %v2534_v49   ;;  %1213 = vperm.xlu0 %1990, %v2541_v58   ;;  %2131 = vrcp.f32 %v569_v25 }
 0x4be   : > { %2133 = vpow2.f32 %v1368_v34 }
 0x4bf   : > { %2135 = vpow2.f32 %v832_v47  ;;  %v3115_v47 = vmov 110  }
 0x4c0   : > { %2137 = vrcp.f32 %v1105_v12 }
 0x4c1   : > { %1970 = vset.pattern.permute.xlu1 %v2248_v20  ;;  %1993 = vset.pattern.permute.xlu0 %v3108_v23  ;;  %v2716_v23 = vld [vmem:[#allocation2 + $0xe] sm:$0xff] }
 0x4c2   : > { %875 = vperm.xlu1 %1970, %v2534_v49   ;;  %1227 = vperm.xlu0 %1993, %v2541_v58  }
 0x4c6   : > { %1972 = vset.pattern.permute.xlu1 %v2250_v21  ;;  %1996 = vset.pattern.permute.xlu0 %v3105_v28  ;;  %v2701_v28 = vld [vmem:[#allocation2 + $0xb] sm:$0xff] }
 0x4c7   : > { %1129 = vperm.xlu1 %1972, %v2541_v58   ;;  %1241 = vperm.xlu0 %1996, %v2541_v58   ;;  %v2132_v6 = vpop.eup %2131 }
 0x4c8   : > { %v2134_v11 = vpop.eup %2133  ;;  %v2612_v19 = vmul.f32 %v2132_v6, %v2488_v51  ;;  %v3109_v6 = vmov 112  }
 0x4c9   : > { %v1371_v26 = vmul.f32 15.0, %v2134_v11 }
 0x4cb   : > { %1973 = vset.pattern.permute.xlu1 %v2252_v16  ;;  %1999 = vset.pattern.permute.xlu0 %v3103_v18  ;;  %v1373_v15 = vadd.f32 %v1371_v26, %v1363_v24  ;;  %v2656_v24 = vld [vmem:[#allocation2 + $0x2] sm:$0xff] }
 0x4cc   : > { %1255 = vperm.xlu0 %1999, %v2541_v58   ;;  %1382 = vperm.xlu1 %1973, %v2586_v31   ;;  %v2658_v26 = vld [vmem:[#allocation2 + $0x4] sm:$0xff] }
 0x4cd   : > { %2139 = vrcp.f32 %v1373_v15 }
 0x4d0   : > { %2002 = vset.pattern.permute.xlu0 %v3102_v22  ;;  %1974 = vset.pattern.permute.xlu1 %v2255_v50  ;;  %v2696_v22 = vld [vmem:[#allocation2 + $0xa] sm:$0xff] }
 0x4d1   : > { %1269 = vperm.xlu0 %2002, %v2541_v58   ;;  %1397 = vperm.xlu1 %1974, %v2586_v31  }
 0x4d5   : > { %2005 = vset.pattern.permute.xlu0 %v3101_v38  ;;  %1976 = vset.pattern.permute.xlu1 %v2257_v43 }
 0x4d6   : > { %1283 = vperm.xlu0 %2005, %v2541_v58   ;;  %889 = vperm.xlu1 %1976, %v2534_v49  }
 0x4da   : > { %2008 = vset.pattern.permute.xlu0 %v3100_v57  ;;  %1977 = vset.pattern.permute.xlu1 %v2259_v40 }
 0x4db   : > { %1297 = vperm.xlu0 %2008, %v2541_v58   ;;  %1411 = vperm.xlu1 %1977, %v2586_v31  }
 0x4df   : > { %2011 = vset.pattern.permute.xlu0 %v3099_v4  ;;  %1979 = vset.pattern.permute.xlu1 %v2261_v5 }
 0x4e0   : > { %1311 = vperm.xlu0 %2011, %v2541_v58   ;;  %903 = vperm.xlu1 %1979, %v2534_v49   ;;  %v2136_v58 = vpop.eup %2135 }
 0x4e1   : > { %v835_v29 = vmul.f32 15.0, %v2136_v58  ;;  %v2138_v25 = vpop.eup %2137  ;;  %v2271_v58 = vmov 54  }
 0x4e2   : > { %v2626_v34 = vmul.f32 %v2138_v25, %v2494_v53  ;;  %v2140_v41 = vpop.eup %2139 }
 0x4e3   : > { %v837_v51 = vadd.f32 %v835_v29, %v827_v17  ;;  %v2663_v17 = vld [vmem:[#allocation2 + $0x5] sm:$0xff] }
 0x4e4   : > { %2012 = vset.pattern.permute.xlu0 %v2225_v9  ;;  %1980 = vset.pattern.permute.xlu1 %v3120_v32  ;;  %v3118_v9 = vmov 109  }
 0x4e5   : > { %1425 = vperm.xlu1 %1980, %v2586_v31   ;;  %583 = vperm.xlu0 %2012, %v2612_v19   ;;  %2141 = vrcp.f32 %v837_v51 }
 0x4e9   : > { %1982 = vset.pattern.permute.xlu1 %v2263_v35  ;;  %2018 = vset.pattern.permute.xlu0 %v2235_v60  ;;  %v2265_v60 = vmov 51  }
 0x4ea   : > { %917 = vperm.xlu1 %1982, %v2534_v49   ;;  %667 = vperm.xlu0 %2018, %v2612_v19  }
 0x4ee   : > { %1983 = vset.pattern.permute.xlu1 %v3118_v9  ;;  %2021 = vset.pattern.permute.xlu0 %v2238_v63  ;;  %v2632_v63 = vmul.f32 %v2140_v41, %v2497_v54  ;;  %v3113_v54 = vmov 111  }
 0x4ef   : > { %1439 = vperm.xlu1 %1983, %v2586_v31   ;;  %709 = vperm.xlu0 %2021, %v2612_v19   ;;  %v2142_v33 = vpop.eup %2141 }
 0x4f0   : > { %v2639_v53 = vmul.f32 %v2142_v33, %v2490_v52  ;;  %v2269_v52 = vmov 53   ;;  %v3107_v33 = vmov 113  }
 0x4f3   : > { %1985 = vset.pattern.permute.xlu1 %v2265_v60  ;;  %2030 = vset.pattern.permute.xlu0 %v2250_v21  ;;  %v2267_v21 = vmov 52  }
 0x4f4   : > { %931 = vperm.xlu1 %1985, %v2534_v49   ;;  %1133 = vperm.xlu0 %2030, %v2626_v34  }
 0x4f8   : > { %1986 = vset.pattern.permute.xlu1 %v3115_v47  ;;  %2032 = vset.pattern.permute.xlu0 %v2252_v16  ;;  %v3121_v47 = vmov 118  }
 0x4f9   : > { %1453 = vperm.xlu1 %1986, %v2586_v31   ;;  %1387 = vperm.xlu0 %2032, %v2632_v63  }
 0x4fd   : > { %1988 = vset.pattern.permute.xlu1 %v2267_v21  ;;  %2035 = vset.pattern.permute.xlu0 %v2257_v43 }
 0x4fe   : > { %945 = vperm.xlu1 %1988, %v2534_v49   ;;  %893 = vperm.xlu0 %2035, %v2639_v53  }
 0x502   : > { %1989 = vset.pattern.permute.xlu1 %v3113_v54  ;;  %2038 = vset.pattern.permute.xlu0 %v2261_v5  ;;  %v2652_v5 = vld [vmem:[#allocation2 + $0x3] sm:$0xff] }
 0x503   : > { %1467 = vperm.xlu1 %1989, %v2586_v31   ;;  %907 = vperm.xlu0 %2038, %v2639_v53  }
 0x505   : > { %v579_v16 = vpop.permute.xlu1 %578  ;;  %v650_v37 = vpop.permute.xlu0 %649 }
 0x506   : > { %v586_v29 = vmul.f32 %v579_v16, %v2656_v24 }
 0x507   : > { %1991 = vset.pattern.permute.xlu1 %v2269_v52  ;;  %2041 = vset.pattern.permute.xlu0 %v2263_v35 }
 0x508   : > { %959 = vperm.xlu1 %1991, %v2534_v49   ;;  %921 = vperm.xlu0 %2041, %v2639_v53  }
 0x50a   : > { %v594_v43 = vpop.permute.xlu1 %593  ;;  %v692_v48 = vpop.permute.xlu0 %691 }
 0x50b   : > { %v600_v15 = vmul.f32 %v594_v43, %v2652_v5 }
 0x50c   : > { %1992 = vset.pattern.permute.xlu1 %v3109_v6  ;;  %2044 = vset.pattern.permute.xlu0 %v2265_v60 }
 0x50d   : > { %1481 = vperm.xlu1 %1992, %v2586_v31   ;;  %935 = vperm.xlu0 %2044, %v2639_v53   ;;  %v602_v60 = vadd.f32 %v600_v15, %v586_v29  ;;  %v2678_v15 = vld [vmem:[#allocation2 + $0x7] sm:$0xff]  ;;  %v2273_v29 = vmov 55  }
 0x50f   : > { %v608_v11 = vpop.permute.xlu1 %607  ;;  %v2654_v12 = vpop.permute.xlu0 %733 }
 0x510   : > { %v614_v35 = vmul.f32 %v608_v11, %v2658_v26 }
 0x511   : > { %1994 = vset.pattern.permute.xlu1 %v2271_v58  ;;  %2047 = vset.pattern.permute.xlu0 %v2267_v21  ;;  %v2673_v21 = vld [vmem:[#allocation2 + $0x6] sm:$0xff] }
 0x512   : > { %973 = vperm.xlu1 %1994, %v2534_v49   ;;  %949 = vperm.xlu0 %2047, %v2639_v53   ;;  %v616_v43 = vadd.f32 %v614_v35, %v602_v60  ;;  %v656_v35 = vmul.f32 %v650_v37, %v2678_v15 }
 0x514   : > { %v622_v51 = vpop.permute.xlu1 %621  ;;  %v2667_v25 = vpop.permute.xlu0 %747 }
 0x515   : > { %v628_v41 = vmul.f32 %v622_v51, %v2663_v17 }
 0x516   : > { %1995 = vset.pattern.permute.xlu1 %v3107_v33  ;;  %2050 = vset.pattern.permute.xlu0 %v2269_v52  ;;  %v2682_v52 = vld [vmem:[#allocation2 + $0x8] sm:$0xff] }
 0x517   : > { %1495 = vperm.xlu1 %1995, %v2586_v31   ;;  %963 = vperm.xlu0 %2050, %v2639_v53   ;;  %v630_v11 = vadd.f32 %v628_v41, %v616_v43 }
 0x519   : > { %v636_v16 = vpop.permute.xlu1 %635  ;;  %v2675_v1 = vpop.permute.xlu0 %861 }
 0x51a   : > { %v642_v4 = vmul.f32 %v636_v16, %v2673_v21  ;;  %v3104_v16 = vmov 114  }
 0x51b   : > { %1997 = vset.pattern.permute.xlu1 %v2273_v29  ;;  %2053 = vset.pattern.permute.xlu0 %v2271_v58 }
 0x51c   : > { %v644_v51 = vadd.f32 %v642_v4, %v630_v11  ;;  %987 = vperm.xlu1 %1997, %v2534_v49   ;;  %977 = vperm.xlu0 %2053, %v2639_v53   ;;  %v2691_v4 = vld [vmem:[#allocation2 + $0x9] sm:$0xff] }
 0x51e   : > { %v664_v60 = vpop.permute.xlu1 %663  ;;  %v2685_v57 = vpop.permute.xlu0 %1114  ;;  %v658_v41 = vadd.f32 %v656_v35, %v644_v51  ;;  %v2275_v51 = vmov 56   ;;  %v698_v35 = vmul.f32 %v692_v48, %v2696_v22 }
 0x51f   : > { %v670_v43 = vmul.f32 %v664_v60, %v2682_v52  ;;  %v1122_v54 = vmul.f32 %v2685_v57, %v2656_v24 }
 0x520   : > { %1998 = vset.pattern.permute.xlu1 %v3104_v16  ;;  %2056 = vset.pattern.permute.xlu0 %v2273_v29 }
 0x521   : > { %1509 = vperm.xlu1 %1998, %v2586_v31   ;;  %991 = vperm.xlu0 %2056, %v2639_v53   ;;  %v672_v37 = vadd.f32 %v670_v43, %v658_v41  ;;  %v3106_v43 = vmov 115  }
 0x523   : > { %v678_v58 = vpop.permute.xlu1 %677  ;;  %v2693_v11 = vpop.permute.xlu0 %1143 }
 0x524   : > { %v684_v38 = vmul.f32 %v678_v58, %v2691_v4  ;;  %v2277_v58 = vmov 57  }
 0x525   : > { %2000 = vset.pattern.permute.xlu1 %v2275_v51  ;;  %2059 = vset.pattern.permute.xlu0 %v2275_v51 }
 0x526   : > { %v686_v29 = vadd.f32 %v684_v38, %v672_v37  ;;  %1001 = vperm.xlu1 %2000, %v2534_v49   ;;  %1005 = vperm.xlu0 %2059, %v2639_v53   ;;  %v2707_v38 = vld [vmem:[#allocation2 + $0xc] sm:$0xff] }
 0x528   : > { %v706_v60 = vpop.permute.xlu1 %705  ;;  %v700_v18 = vadd.f32 %v698_v35, %v686_v29  ;;  %v1158_v16 = vpop.permute.xlu0 %1157  ;;  %v2710_v29 = vld [vmem:[#allocation2 + $0xd] sm:$0xff] }
 0x529   : > { %v712_v41 = vmul.f32 %v706_v60, %v2701_v28  ;;  %v2278_v60 = vmov 58  }
 0x52a   : > { %2001 = vset.pattern.permute.xlu1 %v3106_v43  ;;  %2062 = vset.pattern.permute.xlu0 %v2277_v58  ;;  %v740_v43 = vmul.f32 %v2654_v12, %v2710_v29  ;;  %v2280_v12 = vmov 59  }
 0x52b   : > { %1523 = vperm.xlu1 %2001, %v2586_v31   ;;  %1019 = vperm.xlu0 %2062, %v2639_v53   ;;  %v714_v51 = vadd.f32 %v712_v41, %v700_v18  ;;  %v754_v18 = vmul.f32 %v2667_v25, %v2716_v23  ;;  %v3112_v25 = vmov 119  }
 0x52d   : > { %v720_v48 = vpop.permute.xlu1 %719  ;;  %v1172_v37 = vpop.permute.xlu0 %1171 }
 0x52e   : > { %v726_v35 = vmul.f32 %v720_v48, %v2707_v38  ;;  %v1178_v32 = vmul.f32 %v1172_v37, %v2673_v21 }
 0x52f   : > { %2003 = vset.pattern.permute.xlu1 %v2277_v58  ;;  %2065 = vset.pattern.permute.xlu0 %v2278_v60 }
 0x530   : > { %v728_v33 = vadd.f32 %v726_v35, %v714_v51  ;;  %1015 = vperm.xlu1 %2003, %v2534_v49   ;;  %1033 = vperm.xlu0 %2065, %v2639_v53  }
 0x532   : > { %v742_v41 = vadd.f32 %v740_v43, %v728_v33  ;;  %v2720_v48 = vpop.permute.xlu1 %761  ;;  %v1186_v6 = vpop.permute.xlu0 %1185 }
 0x534   : > { %v2722_v58 = vadd.f32 %v754_v18, %v742_v41  ;;  %2004 = vset.pattern.permute.xlu1 %v3111_v14  ;;  %2068 = vset.pattern.permute.xlu0 %v2280_v12  ;;  %v3116_v18 = vmov 117  }
 0x535   : > { %1537 = vperm.xlu1 %2004, %v2586_v31   ;;  %1047 = vperm.xlu0 %2068, %v2639_v53  }
 0x537   : > { %v2727_v51 = vpop.permute.xlu1 %775  ;;  %v1200_v35 = vpop.permute.xlu0 %1199 }
 0x539   : > { %2006 = vset.pattern.permute.xlu1 %v2278_v60  ;;  %2072 = vset.pattern.permute.xlu0 %v3112_v25 }
 0x53a   : > { %1029 = vperm.xlu1 %2006, %v2534_v49   ;;  %1583 = vperm.xlu0 %2072, %v2632_v63  }
 0x53c   : > { %v2732_v33 = vpop.permute.xlu1 %846  ;;  %v1214_v43 = vpop.permute.xlu0 %1213 }
 0x53e   : > { %2007 = vset.pattern.permute.xlu1 %v3116_v18  ;;  %v1150_v18 = vmul.f32 %v2693_v11, %v2658_v26 }
 0x53f   : > { %1551 = vperm.xlu1 %2007, %v2586_v31  }
 0x541   : > { %v2736_v41 = vpop.permute.xlu1 %875  ;;  %v1228_v14 = vpop.permute.xlu0 %1227 }
 0x543   : > { %2009 = vset.pattern.permute.xlu1 %v2280_v12  ;;  %v1164_v12 = vmul.f32 %v1158_v16, %v2663_v17 }
 0x544   : > { %1043 = vperm.xlu1 %2009, %v2534_v49  }
 0x546   : > { %v1130_v60 = vpop.permute.xlu1 %1129  ;;  %v1242_v25 = vpop.permute.xlu0 %1241 }
 0x547   : > { %v1136_v10 = vmul.f32 %v1130_v60, %v2652_v5  ;;  %v1192_v60 = vmul.f32 %v1186_v6, %v2678_v15 }
 0x548   : > { %2010 = vset.pattern.permute.xlu1 %v3121_v47 }
 0x549   : > { %v1138_v3 = vadd.f32 %v1136_v10, %v1122_v54  ;;  %1565 = vperm.xlu1 %2010, %v2586_v31   ;;  %v1206_v54 = vmul.f32 %v1200_v35, %v2682_v52 }
 0x54b   : > { %v1152_v9 = vadd.f32 %v1150_v18, %v1138_v3  ;;  %v2747_v49 = vpop.permute.xlu1 %1382  ;;  %v1256_v30 = vpop.permute.xlu0 %1255  ;;  %v1220_v3 = vmul.f32 %v1214_v43, %v2691_v4 }
 0x54d   : > { %v1166_v57 = vadd.f32 %v1164_v12, %v1152_v9  ;;  %2013 = vset.pattern.permute.xlu1 %v2227_v39  ;;  %v1234_v39 = vmul.f32 %v1228_v14, %v2696_v22  ;;  %v1248_v12 = vmul.f32 %v1242_v25, %v2701_v28  ;;  %v2772_v25 = vld [vmem:[#allocation2 + $0xf] sm:$0xff] }
 0x54e   : > { %597 = vperm.xlu1 %2013, %v2612_v19  }
 0x54f   : > { %v1180_v47 = vadd.f32 %v1178_v32, %v1166_v57 }
 0x550   : > { %v2753_v11 = vpop.permute.xlu1 %1397  ;;  %v1270_v10 = vpop.permute.xlu0 %1269 }
 0x551   : > { %v1194_v16 = vadd.f32 %v1192_v60, %v1180_v47  ;;  %v1276_v14 = vmul.f32 %v1270_v10, %v2710_v29 }
 0x552   : > { %2014 = vset.pattern.permute.xlu1 %v2229_v44  ;;  %v1262_v44 = vmul.f32 %v1256_v30, %v2707_v38 }
 0x553   : > { %v1208_v18 = vadd.f32 %v1206_v54, %v1194_v16  ;;  %611 = vperm.xlu1 %2014, %v2612_v19  }
 0x555   : > { %v1222_v9 = vadd.f32 %v1220_v3, %v1208_v18  ;;  %v2760_v37 = vpop.permute.xlu1 %889  ;;  %v1284_v6 = vpop.permute.xlu0 %1283 }
 0x556   : > { %v1290_v54 = vmul.f32 %v1284_v6, %v2716_v23 }
 0x557   : > { %v1236_v32 = vadd.f32 %v1234_v39, %v1222_v9  ;;  %2015 = vset.pattern.permute.xlu1 %v2231_v46  ;;  %v2774_v46 = vld [vmem:[#allocation2 + $0x10] sm:$0xff] }
 0x558   : > { %625 = vperm.xlu1 %2015, %v2612_v19  }
 0x559   : > { %v1250_v47 = vadd.f32 %v1248_v12, %v1236_v32 }
 0x55a   : > { %v2766_v35 = vpop.permute.xlu1 %1411  ;;  %v1298_v43 = vpop.permute.xlu0 %1297 }
 0x55b   : > { %v1264_v57 = vadd.f32 %v1262_v44, %v1250_v47  ;;  %v1304_v30 = vmul.f32 %v1298_v43, %v2772_v25 }
 0x55c   : > { %2016 = vset.pattern.permute.xlu1 %v2233_v56 }
 0x55d   : > { %v1278_v60 = vadd.f32 %v1276_v14, %v1264_v57  ;;  %639 = vperm.xlu1 %2016, %v2612_v19  }
 0x55f   : > { %v1292_v16 = vadd.f32 %v1290_v54, %v1278_v60  ;;  %v904_v3 = vpop.permute.xlu1 %903  ;;  %v1312_v18 = vpop.permute.xlu0 %1311 }
 0x560   : > { %v1318_v39 = vmul.f32 %v1312_v18, %v2774_v46  ;;  %v910_v44 = vmul.f32 %v904_v3, %v2673_v21  ;;  %v1390_v3 = vmul.f32 %v2747_v49, %v2656_v24  ;;  %v1418_v18 = vmul.f32 %v2766_v35, %v2658_v26 }
 0x561   : > { %v1306_v9 = vadd.f32 %v1304_v30, %v1292_v16  ;;  %2017 = vset.pattern.permute.xlu1 %v2224_v8  ;;  %v3125_v35 = vmov 79  }
 0x562   : > { %653 = vperm.xlu1 %2017, %v2612_v19  }
 0x563   : > { %v2780_v56 = vadd.f32 %v1318_v39, %v1306_v9  ;;  %v3124_v39 = vmov 108  }
 0x564   : > { %v2782_v10 = vpop.permute.xlu1 %1425 }
 0x566   : > { %2019 = vset.pattern.permute.xlu1 %v2236_v61 }
 0x567   : > { %681 = vperm.xlu1 %2019, %v2612_v19  }
 0x569   : > { %v918_v6 = vpop.permute.xlu1 %917 }
 0x56b   : > { %2020 = vset.pattern.permute.xlu1 %v2226_v36 }
 0x56c   : > { %695 = vperm.xlu1 %2020, %v2612_v19  }
 0x56e   : > { %v2788_v32 = vpop.permute.xlu1 %1439 }
 0x570   : > { %2022 = vset.pattern.permute.xlu1 %v2240_v27 }
 0x571   : > { %723 = vperm.xlu1 %2022, %v2612_v19  }
 0x573   : > { %v932_v8 = vpop.permute.xlu1 %931 }
 0x575   : > { %2023 = vset.pattern.permute.xlu1 %v2228_v42 }
 0x576   : > { %737 = vperm.xlu1 %2023, %v2612_v19  }
 0x578   : > { %v2794_v12 = vpop.permute.xlu1 %1453 }
 0x57a   : > { %2024 = vset.pattern.permute.xlu1 %v2230_v45 }
 0x57b   : > { %751 = vperm.xlu1 %2024, %v2612_v19  }
 0x57d   : > { %v946_v36 = vpop.permute.xlu1 %945 }
 0x57e   : > { %v952_v14 = vmul.f32 %v946_v36, %v2691_v4 }
 0x57f   : > { %2025 = vset.pattern.permute.xlu1 %v2242_v2 }
 0x580   : > { %765 = vperm.xlu1 %2025, %v2612_v19  }
 0x582   : > { %v2800_v61 = vpop.permute.xlu1 %1467 }
 0x584   : > { %2026 = vset.pattern.permute.xlu1 %v2244_v7 }
 0x585   : > { %779 = vperm.xlu1 %2026, %v2612_v19   ;;  %v882_v19 = vmul.f32 %v2736_v41, %v2658_v26 }
 0x587   : > { %v960_v42 = vpop.permute.xlu1 %959 }
 0x588   : > { %v966_v60 = vmul.f32 %v960_v42, %v2696_v22 }
 0x589   : > { %2027 = vset.pattern.permute.xlu1 %v2246_v13 }
 0x58a   : > { %851 = vperm.xlu1 %2027, %v2639_v53  }
 0x58c   : > { %v2806_v27 = vpop.permute.xlu1 %1481 }
 0x58e   : > { %2028 = vset.pattern.permute.xlu1 %v2232_v55  ;;  %v854_v55 = vmul.f32 %v2732_v33, %v2656_v24  ;;  %v1446_v24 = vmul.f32 %v2788_v32, %v2673_v21 }
 0x58f   : > { %865 = vperm.xlu1 %2028, %v2639_v53  }
 0x591   : > { %v974_v45 = vpop.permute.xlu1 %973 }
 0x592   : > { %v980_v30 = vmul.f32 %v974_v45, %v2701_v28 }
 0x593   : > { %2029 = vset.pattern.permute.xlu1 %v2234_v59  ;;  %v868_v59 = vmul.f32 %v2675_v1, %v2652_v5  ;;  %v924_v1 = vmul.f32 %v918_v6, %v2678_v15 }
 0x594   : > { %1119 = vperm.xlu1 %2029, %v2626_v34  }
 0x596   : > { %v2812_v2 = vpop.permute.xlu1 %1495 }
 0x598   : > { %2031 = vset.pattern.permute.xlu1 %v2248_v20  ;;  %v870_v20 = vadd.f32 %v868_v59, %v854_v55  ;;  %v1474_v55 = vmul.f32 %v2800_v61, %v2682_v52  ;;  %v3127_v61 = vmov 80  }
 0x599   : > { %879 = vperm.xlu1 %2031, %v2639_v53  }
 0x59a   : > { %v884_v47 = vadd.f32 %v882_v19, %v870_v20  ;;  %v1488_v20 = vmul.f32 %v2806_v27, %v2691_v4 }
 0x59b   : > { %v988_v7 = vpop.permute.xlu1 %987 }
 0x59c   : > { %v994_v9 = vmul.f32 %v988_v7, %v2707_v38  ;;  %v1460_v7 = vmul.f32 %v2794_v12, %v2678_v15  ;;  %v1502_v12 = vmul.f32 %v2812_v2, %v2696_v22 }
 0x59d   : > { %2033 = vset.pattern.permute.xlu1 %v2255_v50  ;;  %v896_v50 = vmul.f32 %v2760_v37, %v2663_v17 }
 0x59e   : > { %1401 = vperm.xlu1 %2033, %v2632_v63  }
 0x59f   : > { %v898_v33 = vadd.f32 %v896_v50, %v884_v47  ;;  %v3126_v50 = vmov 109  }
 0x5a0   : > { %v1510_v13 = vpop.permute.xlu1 %1509 }
 0x5a1   : > { %v912_v41 = vadd.f32 %v910_v44, %v898_v33 }
 0x5a2   : > { %2034 = vset.pattern.permute.xlu1 %v2237_v62  ;;  %v938_v62 = vmul.f32 %v932_v8, %v2682_v52  ;;  %v1516_v52 = vmul.f32 %v1510_v13, %v2701_v28 }
 0x5a3   : > { %1147 = vperm.xlu1 %2034, %v2626_v34   ;;  %v926_v57 = vadd.f32 %v924_v1, %v912_v41 }
 0x5a5   : > { %v1002_v53 = vpop.permute.xlu1 %1001  ;;  %v940_v37 = vadd.f32 %v938_v62, %v926_v57 }
 0x5a6   : > { %v1008_v8 = vmul.f32 %v1002_v53, %v2710_v29 }
 0x5a7   : > { %2036 = vset.pattern.permute.xlu1 %v2259_v40  ;;  %v1404_v40 = vmul.f32 %v2753_v11, %v2652_v5  ;;  %v954_v16 = vadd.f32 %v952_v14, %v940_v37  ;;  %v1432_v5 = vmul.f32 %v2782_v10, %v2663_v17  ;;  %v3128_v14 = vmov 110  }
 0x5a8   : > { %1415 = vperm.xlu1 %2036, %v2632_v63  }
 0x5a9   : > { %v1406_v6 = vadd.f32 %v1404_v40, %v1390_v3  ;;  %v584_v3 = vpop.permute.xlu0 %583 }
 0x5aa   : > { %v1524_v43 = vpop.permute.xlu1 %1523 }
 0x5ab   : > { %v1420_v42 = vadd.f32 %v1418_v18, %v1406_v6  ;;  %v1530_v1 = vmul.f32 %v1524_v43, %v2707_v38  ;;  %v3130_v18 = vmov 111  }
 0x5ac   : > { %2037 = vset.pattern.permute.xlu1 %v2239_v0  ;;  %v968_v0 = vadd.f32 %v966_v60, %v954_v16 }
 0x5ad   : > { %1161 = vperm.xlu1 %2037, %v2626_v34   ;;  %v1434_v45 = vadd.f32 %v1432_v5, %v1420_v42  ;;  %v3132_v5 = vmov 112  }
 0x5ae   : > { %v982_v11 = vadd.f32 %v980_v30, %v968_v0  ;;  %v668_v0 = vpop.permute.xlu0 %667 }
 0x5af   : > { %v1016_v54 = vpop.permute.xlu1 %1015  ;;  %v1448_v10 = vadd.f32 %v1446_v24, %v1434_v45  ;;  %v3134_v45 = vmov 113  }
 0x5b0   : > { %v996_v26 = vadd.f32 %v994_v9, %v982_v11  ;;  %v1022_v49 = vmul.f32 %v1016_v54, %v2716_v23  ;;  %v3129_v54 = vmov 81   ;;  %v3131_v9 = vmov 82  }
 0x5b1   : > { %2039 = vset.pattern.permute.xlu1 %v3124_v39  ;;  %v1462_v32 = vadd.f32 %v1460_v7, %v1448_v10 }
 0x5b2   : > { %1429 = vperm.xlu1 %2039, %v2632_v63   ;;  %v1010_v17 = vadd.f32 %v1008_v8, %v996_v26  ;;  %v710_v11 = vpop.permute.xlu0 %709 }
 0x5b3   : > { %v1476_v15 = vadd.f32 %v1474_v55, %v1462_v32 }
 0x5b4   : > { %v1538_v36 = vpop.permute.xlu1 %1537  ;;  %v1024_v19 = vadd.f32 %v1022_v49, %v1010_v17  ;;  %v587_v49 = vmul.f32 %v2696_v22, %v584_v3 }
 0x5b5   : > { %v1490_v44 = vadd.f32 %v1488_v20, %v1476_v15  ;;  %v1544_v27 = vmul.f32 %v1538_v36, %v2710_v29  ;;  %v3133_v36 = vmov 83  }
 0x5b6   : > { %2040 = vset.pattern.permute.xlu1 %v3125_v35  ;;  %v2890_v42 = vpop.permute.xlu0 %1133 }
 0x5b7   : > { %1175 = vperm.xlu1 %2040, %v2626_v34   ;;  %v1504_v33 = vadd.f32 %v1502_v12, %v1490_v44  ;;  %v671_v44 = vmul.f32 %v2774_v46, %v668_v0  ;;  %v3139_v0 = vmov 86  }
 0x5b9   : > { %v1030_v59 = vpop.permute.xlu1 %1029  ;;  %v1518_v4 = vadd.f32 %v1516_v52, %v1504_v33  ;;  %v2909_v52 = vld [vmem:[#allocation2 + $0x11] sm:$0xff] }
 0x5ba   : > { %v1036_v21 = vmul.f32 %v1030_v59, %v2772_v25  ;;  %v2898_v10 = vpop.permute.xlu0 %1387 }
 0x5bb   : > { %2042 = vset.pattern.permute.xlu1 %v3126_v50  ;;  %v1532_v57 = vadd.f32 %v1530_v1, %v1518_v4 }
 0x5bc   : > { %v1038_v53 = vadd.f32 %v1036_v21, %v1024_v19  ;;  %1443 = vperm.xlu1 %2042, %v2632_v63   ;;  %v3135_v21 = vmov 84  }
 0x5bd   : > { %v1546_v13 = vadd.f32 %v1544_v27, %v1532_v57  ;;  %v2914_v27 = vld [vmem:[#allocation2 + $0x12] sm:$0xff] }
 0x5be   : > { %v1552_v47 = vpop.permute.xlu1 %1551  ;;  %v2904_v15 = vpop.permute.xlu0 %893 }
 0x5bf   : > { %v1558_v2 = vmul.f32 %v1552_v47, %v2716_v23  ;;  %v3136_v47 = vmov 114  }
 0x5c0   : > { %2043 = vset.pattern.permute.xlu1 %v3127_v61 }
 0x5c1   : > { %1189 = vperm.xlu1 %2043, %v2626_v34   ;;  %v1560_v43 = vadd.f32 %v1558_v2, %v1546_v13  ;;  %v3138_v13 = vmov 115  }
 0x5c2   : > { %v2912_v4 = vpop.permute.xlu0 %907 }
 0x5c3   : > { %v1044_v41 = vpop.permute.xlu1 %1043 }
 0x5c4   : > { %v1050_v62 = vmul.f32 %v1044_v41, %v2774_v46  ;;  %v3137_v41 = vmov 85  }
 0x5c5   : > { %2045 = vset.pattern.permute.xlu1 %v3128_v14 }
 0x5c6   : > { %v2874_v37 = vadd.f32 %v1050_v62, %v1038_v53  ;;  %1457 = vperm.xlu1 %2045, %v2632_v63  }
 0x5c8   : > { %v1566_v60 = vpop.permute.xlu1 %1565 }
 0x5c9   : > { %v1572_v40 = vmul.f32 %v1566_v60, %v2772_v25  ;;  %v2920_v60 = vld [vmem:[#allocation2 + $0x13] sm:$0xff] }
 0x5ca   : > { %2046 = vset.pattern.permute.xlu1 %v3129_v54  ;;  %v2926_v54 = vld [vmem:[#allocation2 + $0x14] sm:$0xff] }
 0x5cb   : > { %v2879_v16 = vadd.f32 %v1572_v40, %v1560_v43  ;;  %1203 = vperm.xlu1 %2046, %v2626_v34   ;;  %v2922_v43 = vpop.permute.xlu0 %921  ;;  %v713_v40 = vmul.f32 %v710_v11, %v2920_v60 }
 0x5cd   : > { %v598_v30 = vpop.permute.xlu1 %597 }
 0x5ce   : > { %v601_v24 = vmul.f32 %v2701_v28, %v598_v30 }
 0x5cf   : > { %2048 = vset.pattern.permute.xlu1 %v3130_v18 }
 0x5d0   : > { %1471 = vperm.xlu1 %2048, %v2632_v63   ;;  %v603_v7 = vadd.f32 %v601_v24, %v587_v49  ;;  %v2937_v24 = vld [vmem:[#allocation2 + $0x17] sm:$0xff] }
 0x5d2   : > { %v612_v39 = vpop.permute.xlu1 %611 }
 0x5d3   : > { %v615_v35 = vmul.f32 %v2707_v38, %v612_v39  ;;  %v2929_v39 = vld [vmem:[#allocation2 + $0x15] sm:$0xff] }
 0x5d4   : > { %2049 = vset.pattern.permute.xlu1 %v3131_v9 }
 0x5d5   : > { %1217 = vperm.xlu1 %2049, %v2626_v34   ;;  %v617_v59 = vadd.f32 %v615_v35, %v603_v7  ;;  %v782_v7 = vmul.f32 %v2727_v51, %v2774_v46 }
 0x5d7   : > { %v626_v6 = vpop.permute.xlu1 %625 }
 0x5d8   : > { %v629_v17 = vmul.f32 %v2710_v29, %v626_v6  ;;  %v936_v6 = vpop.permute.xlu0 %935 }
 0x5d9   : > { %2051 = vset.pattern.permute.xlu1 %v3132_v5  ;;  %v2934_v5 = vld [vmem:[#allocation2 + $0x16] sm:$0xff] }
 0x5da   : > { %1485 = vperm.xlu1 %2051, %v2632_v63   ;;  %v631_v32 = vadd.f32 %v629_v17, %v617_v59  ;;  %v2946_v59 = vld [vmem:[#allocation2 + $0x18] sm:$0xff] }
 0x5dc   : > { %v640_v8 = vpop.permute.xlu1 %639 }
 0x5dd   : > { %v643_v19 = vmul.f32 %v2716_v23, %v640_v8 }
 0x5de   : > { %2052 = vset.pattern.permute.xlu1 %v3133_v36 }
 0x5df   : > { %1231 = vperm.xlu1 %2052, %v2626_v34   ;;  %v645_v50 = vadd.f32 %v643_v19, %v631_v32 }
 0x5e1   : > { %v654_v26 = vpop.permute.xlu1 %653 }
 0x5e2   : > { %v657_v20 = vmul.f32 %v2772_v25, %v654_v26  ;;  %v768_v26 = vmul.f32 %v2720_v48, %v2772_v25 }
 0x5e3   : > { %2054 = vset.pattern.permute.xlu1 %v3134_v45  ;;  %v3140_v45 = vmov 116  }
 0x5e4   : > { %1499 = vperm.xlu1 %2054, %v2632_v63   ;;  %v659_v12 = vadd.f32 %v657_v20, %v645_v50  ;;  %v3141_v20 = vmov 87  }
 0x5e6   : > { %v682_v55 = vpop.permute.xlu1 %681  ;;  %v673_v33 = vadd.f32 %v671_v44, %v659_v12  ;;  %v3142_v44 = vmov 117  }
 0x5e7   : > { %v685_v1 = vmul.f32 %v2909_v52, %v682_v55  ;;  %v950_v55 = vpop.permute.xlu0 %949 }
 0x5e8   : > { %2055 = vset.pattern.permute.xlu1 %v3135_v21  ;;  %v770_v21 = vadd.f32 %v768_v26, %v2722_v58  ;;  %v1391_v26 = vmul.f32 %v2898_v10, %v2696_v22 }
 0x5e9   : > { %1245 = vperm.xlu1 %2055, %v2626_v34   ;;  %v687_v57 = vadd.f32 %v685_v1, %v673_v33  ;;  %v3143_v33 = vmov 88  }
 0x5ea   : > { %v784_v50 = vadd.f32 %v782_v7, %v770_v21  ;;  %v3146_v7 = vmov 119   ;;  %v953_v21 = vmul.f32 %v950_v55, %v2909_v52  ;;  %v2078_v55 = vld [vmem:[%s3094_s6 + $0x8] sm:$0xff]  }
 0x5eb   : > { %v696_v53 = vpop.permute.xlu1 %695  ;;  %v964_v51 = vpop.permute.xlu0 %963 }
 0x5ec   : > { %v699_v62 = vmul.f32 %v2914_v27, %v696_v53 }
 0x5ed   : > { %2057 = vset.pattern.permute.xlu1 %v3136_v47 }
 0x5ee   : > { %1513 = vperm.xlu1 %2057, %v2632_v63   ;;  %v701_v14 = vadd.f32 %v699_v62, %v687_v57 }
 0x5ef   : > { %v978_v58 = vpop.permute.xlu0 %977 }
 0x5f0   : > { %v724_v61 = vpop.permute.xlu1 %723  ;;  %v715_v3 = vadd.f32 %v713_v40, %v701_v14 }
 0x5f1   : > { %v727_v18 = vmul.f32 %v2926_v54, %v724_v61 }
 0x5f2   : > { %2058 = vset.pattern.permute.xlu1 %v3137_v41  ;;  %v1137_v41 = vmul.f32 %v2890_v42, %v2701_v28  ;;  %v897_v42 = vmul.f32 %v2904_v15, %v2710_v29 }
 0x5f3   : > { %1259 = vperm.xlu1 %2058, %v2626_v34   ;;  %v729_v8 = vadd.f32 %v727_v18, %v715_v3  ;;  %v992_v14 = vpop.permute.xlu0 %991 }
 0x5f5   : > { %v738_v2 = vpop.permute.xlu1 %737 }
 0x5f6   : > { %v741_v9 = vmul.f32 %v2929_v39, %v738_v2  ;;  %v3144_v2 = vmov 118  }
 0x5f7   : > { %2060 = vset.pattern.permute.xlu1 %v3138_v13 }
 0x5f8   : > { %1527 = vperm.xlu1 %2060, %v2632_v63   ;;  %v743_v49 = vadd.f32 %v741_v9, %v729_v8  ;;  %v1006_v8 = vpop.permute.xlu0 %1005 }
 0x5fa   : > { %v752_v30 = vpop.permute.xlu1 %751 }
 0x5fb   : > { %v755_v11 = vmul.f32 %v2934_v5, %v752_v30 }
 0x5fc   : > { %2061 = vset.pattern.permute.xlu1 %v3139_v0  ;;  %v3145_v0 = vmov 89  }
 0x5fd   : > { %1273 = vperm.xlu1 %2061, %v2626_v34   ;;  %v757_v17 = vadd.f32 %v755_v11, %v743_v49  ;;  %v911_v11 = vmul.f32 %v2912_v4, %v2716_v23  ;;  %v1020_v4 = vpop.permute.xlu0 %1019 }
 0x5ff   : > { %v766_v36 = vpop.permute.xlu1 %765 }
 0x600   : > { %v769_v35 = vmul.f32 %v2937_v24, %v766_v36 }
 0x601   : > { %2063 = vset.pattern.permute.xlu1 %v3140_v45 }
 0x602   : > { %1541 = vperm.xlu1 %2063, %v2632_v63   ;;  %v771_v32 = vadd.f32 %v769_v35, %v757_v17  ;;  %v925_v35 = vmul.f32 %v2922_v43, %v2772_v25 }
 0x604   : > { %v780_v19 = vpop.permute.xlu1 %779 }
 0x605   : > { %v783_v48 = vmul.f32 %v2946_v59, %v780_v19 }
 0x606   : > { %2064 = vset.pattern.permute.xlu1 %v3141_v20 }
 0x607   : > { %v785_v53 = vadd.f32 %v783_v48, %v771_v32  ;;  %1287 = vperm.xlu1 %2064, %v2626_v34   ;;  %v2077_v48 = vld [vmem:[%s3094_s6] sm:$0xff]  }
 0x608   : > { %1834 = vmatpush3.bf16.msra.mxu0 %v2077_v48 }
 0x609   : > { %v786_v12 = vpack.c.bf16 %v785_v53, %v784_v50  ;;  %v852_v47 = vpop.permute.xlu1 %851  ;;  %v1034_v50 = vpop.permute.xlu0 %1033 }
 0x60a   : > { %v855_v40 = vmul.f32 %v852_v47, %v2696_v22 }
 0x60b   : > { %788 = vst.msk [vmem:[#allocation3] sm:$0xff] %vm787_vm7, %v786_v12  ;;  %2066 = vset.pattern.permute.xlu1 %v3142_v44  ;;  %v995_v12 = vmul.f32 %v992_v14, %v2926_v54 }
 0x60c   : > { %1555 = vperm.xlu1 %2066, %v2632_v63  }
 0x60e   : > { %v866_v61 = vpop.permute.xlu1 %865 }
 0x60f   : > { %v869_v57 = vmul.f32 %v866_v61, %v2701_v28  ;;  %v1009_v61 = vmul.f32 %v1006_v8, %v2929_v39 }
 0x610   : > { %2067 = vset.pattern.permute.xlu1 %v3143_v33 }
 0x611   : > { %1301 = vperm.xlu1 %2067, %v2626_v34   ;;  %v871_v3 = vadd.f32 %v869_v57, %v855_v40  ;;  %v1037_v57 = vmul.f32 %v1034_v50, %v2937_v24 }
 0x613   : > { %v1120_v1 = vpop.permute.xlu1 %1119 }
 0x614   : > { %v1123_v62 = vmul.f32 %v1120_v1, %v2696_v22  ;;  %v1023_v1 = vmul.f32 %v1020_v4, %v2934_v5 }
 0x615   : > { %2069 = vset.pattern.permute.xlu1 %v3144_v2 }
 0x616   : > { %v1139_v13 = vadd.f32 %v1137_v41, %v1123_v62  ;;  %1569 = vperm.xlu1 %2069, %v2632_v63   ;;  %v1048_v62 = vpop.permute.xlu0 %1047 }
 0x617   : > { %v1051_v14 = vmul.f32 %v1048_v62, %v2946_v59 }
 0x618   : > { %v880_v30 = vpop.permute.xlu1 %879 }
 0x619   : > { %v883_v18 = vmul.f32 %v880_v30, %v2707_v38 }
 0x61a   : > { %2070 = vset.pattern.permute.xlu1 %v3145_v0 }
 0x61b   : > { %v885_v9 = vadd.f32 %v883_v18, %v871_v3  ;;  %1315 = vperm.xlu1 %2070, %v2626_v34   ;;  %v939_v34 = vmul.f32 %v936_v6, %v2774_v46 }
 0x61d   : > { %v899_v36 = vadd.f32 %v897_v42, %v885_v9  ;;  %v1402_v63 = vpop.permute.xlu1 %1401 }
 0x61e   : > { %v1405_v49 = vmul.f32 %v1402_v63, %v2701_v28  ;;  %v967_v28 = vmul.f32 %v964_v51, %v2914_v27  ;;  %v3147_v51 = vmov 0.0  }
 0x61f   : > { %v913_v45 = vadd.f32 %v911_v11, %v899_v36  ;;  %2071 = vset.pattern.permute.xlu1 %v3146_v7  ;;  %1835 = vmatprep.subr.bf16.mxu0 %v3147_v51 }
 0x620   : > { %v1407_v15 = vadd.f32 %v1405_v49, %v1391_v26  ;;  %1579 = vperm.xlu1 %2071, %v2586_v31   ;;  %v981_v31 = vmul.f32 %v978_v58, %v2920_v60  ;;  %1836 = vmatpush3.bf16.msra.mxu0 %v2078_v55 }
 0x621   : > { %v927_v17 = vadd.f32 %v925_v35, %v913_v45 }
 0x622   : > { %v1148_v19 = vpop.permute.xlu1 %1147 }
 0x623   : > { %v941_v32 = vadd.f32 %v939_v34, %v927_v17  ;;  %v1151_v22 = vmul.f32 %v1148_v19, %v2707_v38 }
 0x625   : > { %v955_v10 = vadd.f32 %v953_v21, %v941_v32  ;;  %v1153_v43 = vadd.f32 %v1151_v22, %v1139_v13 }
 0x627   : > { %v969_v20 = vadd.f32 %v967_v28, %v955_v10  ;;  %v1416_v6 = vpop.permute.xlu1 %1415 }
 0x628   : > { %v1419_v53 = vmul.f32 %v1416_v6, %v2707_v38 }
 0x629   : > { %v983_v47 = vadd.f32 %v981_v31, %v969_v20 }
 0x62a   : > { %v1421_v44 = vadd.f32 %v1419_v53, %v1407_v15 }
 0x62b   : > { %v997_v33 = vadd.f32 %v995_v12, %v983_v47 }
 0x62c   : > { %v1162_v58 = vpop.permute.xlu1 %1161 }
 0x62d   : > { %v1011_v41 = vadd.f32 %v1009_v61, %v997_v33  ;;  %v1165_v38 = vmul.f32 %v1162_v58, %v2710_v29 }
 0x62f   : > { %v1167_v2 = vadd.f32 %v1165_v38, %v1153_v43  ;;  %v1025_v13 = vadd.f32 %v1023_v1, %v1011_v41 }
 0x631   : > { %v1430_v40 = vpop.permute.xlu1 %1429  ;;  %v1039_v30 = vadd.f32 %v1037_v57, %v1025_v13 }
 0x632   : > { %v1433_v3 = vmul.f32 %v1430_v40, %v2710_v29 }
 0x633   : > { %v1053_v18 = vadd.f32 %v1051_v14, %v1039_v30 }
 0x634   : > { %v1435_v0 = vadd.f32 %v1433_v3, %v1421_v44 }
 0x635   : > { %v1054_v42 = vpack.c.bf16 %v1053_v18, %v2874_v37 }
 0x636   : > { %v1176_v9 = vpop.permute.xlu1 %1175 }
 0x637   : > { %1056 = vst.msk [vmem:[#allocation3] sm:$0xff] %vm1055_vm8, %v1054_v42  ;;  %v1179_v21 = vmul.f32 %v1176_v9, %v2716_v23 }
 0x639   : > { %v1181_v28 = vadd.f32 %v1179_v21, %v1167_v2  ;;  %v2148_v21 = vld [vmem:[%s2407_s29 + $0x8] sm:$0xff] }
 0x63b   : > { %v1444_v8 = vpop.permute.xlu1 %1443 }
 0x63c   : > { %v1447_v22 = vmul.f32 %v1444_v8, %v2716_v23 }
 0x63e   : > { %v1449_v6 = vadd.f32 %v1447_v22, %v1435_v0 }
 0x640   : > { %v1190_v11 = vpop.permute.xlu1 %1189 }
 0x641   : > { %v1193_v32 = vmul.f32 %v1190_v11, %v2772_v25 }
 0x643   : > { %v1195_v48 = vadd.f32 %v1193_v32, %v1181_v28 }
 0x645   : > { %v1458_v36 = vpop.permute.xlu1 %1457 }
 0x646   : > { %v1461_v43 = vmul.f32 %v1458_v36, %v2772_v25 }
 0x648   : > { %v1463_v12 = vadd.f32 %v1461_v43, %v1449_v6 }
 0x64a   : > { %v1204_v63 = vpop.permute.xlu1 %1203 }
 0x64b   : > { %v1207_v10 = vmul.f32 %v1204_v63, %v2774_v46  ;;  %v1584_v63 = vpop.permute.xlu0 %1583 }
 0x64d   : > { %v1209_v53 = vadd.f32 %v1207_v10, %v1195_v48 }
 0x64f   : > { %v1472_v26 = vpop.permute.xlu1 %1471 }
 0x650   : > { %v1475_v50 = vmul.f32 %v1472_v26, %v2774_v46 }
 0x652   : > { %v1477_v44 = vadd.f32 %v1475_v50, %v1463_v12 }
 0x654   : > { %v1218_v49 = vpop.permute.xlu1 %1217 }
 0x655   : > { %v1221_v31 = vmul.f32 %v1218_v49, %v2909_v52 }
 0x657   : > { %v1223_v51 = vadd.f32 %v1221_v31, %v1209_v53 }
 0x659   : > { %v1486_v35 = vpop.permute.xlu1 %1485 }
 0x65a   : > { %v1489_v47 = vmul.f32 %v1486_v35, %v2909_v52 }
 0x65c   : > { %v1491_v1 = vadd.f32 %v1489_v47, %v1477_v44 }
 0x65e   : > { %v1232_v45 = vpop.permute.xlu1 %1231 }
 0x65f   : > { %v1235_v55 = vmul.f32 %v1232_v45, %v2914_v27 }
 0x661   : > { %v1237_v33 = vadd.f32 %v1235_v55, %v1223_v51 }
 0x663   : > { %v1500_v7 = vpop.permute.xlu1 %1499 }
 0x664   : > { %v1503_v61 = vmul.f32 %v1500_v7, %v2914_v27 }
 0x666   : > { %v1505_v57 = vadd.f32 %v1503_v61, %v1491_v1  ;;  %v1799_v61 = vld [vmem:[%s3095_s7] ss:$0 sm:$0xff] }
 0x668   : > { %v1246_v15 = vpop.permute.xlu1 %1245 }
 0x669   : > { %v1249_v23 = vmul.f32 %v1246_v15, %v2920_v60 }
 0x66b   : > { %v1251_v38 = vadd.f32 %v1249_v23, %v1237_v33 }
 0x66d   : > { %v1514_v34 = vpop.permute.xlu1 %1513 }
 0x66e   : > { %v1517_v41 = vmul.f32 %v1514_v34, %v2920_v60 }
 0x670   : > { %v1519_v40 = vadd.f32 %v1517_v41, %v1505_v57 }
 0x672   : > { %v1260_v17 = vpop.permute.xlu1 %1259 }
 0x673   : > { %v1263_v58 = vmul.f32 %v1260_v17, %v2926_v54 }
 0x675   : > { %v1265_v52 = vadd.f32 %v1263_v58, %v1251_v38  ;;  %v1800_v58 = vld [vmem:[%s3096_s8] ss:$0 sm:$0xff] }
 0x677   : > { %v1528_v29 = vpop.permute.xlu1 %1527 }
 0x678   : > { %v1531_v2 = vmul.f32 %v1528_v29, %v2926_v54  ;;  %v2147_v29 = vld [vmem:[%s2407_s29] sm:$0xff]  ;;  %s323_s29 = sand.u32 1, %s2203_s10  }
 0x679   : > { %s1781_s16 = sshll.u32 %s323_s29, 4  ;;  %s3047_s13 = scalar_lea.sflag [#allocation5], %s323_s29 }
 0x67a   : > { %v1533_v18 = vadd.f32 %v1531_v2, %v1519_v40  ;;  %s325_s25 = scalar_lea.vmem [#allocation4], %s1781_s16 }
 0x67b   : > { %s1715_s26 = sshll.u32 %s325_s25, 4  ;;  %s3043_s26 = int_to_ptr.vmem [resolvable:$true] %s1715_s26 }
 0x67c   : > { %v1274_v4 = vpop.permute.xlu1 %1273  ;;  %s2149_s16 = scalar_lea.vmem %s3043_s26, 256  ;;  %p2156_p0 = scmp.lt.s32.totalorder %s3043_s26, %s2154_s21 }
 0x67d   : > { %v1277_v62 = vmul.f32 %v1274_v4, %v2929_v39  ;;  %p2150_p11 = scmp.ne.s32.totalorder %s3043_s26, %s2149_s16  ;;  %p2157_p1 = scmp.lt.s32.totalorder %s2155_s22, %s2149_s16 }
 0x67f   : > { %v1279_v30 = vadd.f32 %v1277_v62, %v1265_v52  ;;  %p2151_p12 = pnand %p2150_p11, %p2375_p5  ;;  %p2158_p2 = por %p2157_p1, %p2156_p0 }
 0x681   : > { %v1542_v19 = vpop.permute.xlu1 %1541  ;;  %p2152_p13 = pneg %p2151_p12 }
 0x682   : > { %v1545_v27 = vmul.f32 %v1542_v19, %v2929_v39 }
 0x683   : > { %p2159_p3 = pnand %p2158_p2, %p2152_p13 }
 0x684   : > { %v1547_v42 = vadd.f32 %v1545_v27, %v1533_v18 }
 0x686   : > { %v1288_v37 = vpop.permute.xlu1 %1287 }
 0x687   : > { %v1291_v13 = vmul.f32 %v1288_v37, %v2934_v5 }
 0x689   : > { %v1293_v60 = vadd.f32 %v1291_v13, %v1279_v30 }
 0x68b   : > { %v1556_v20 = vpop.permute.xlu1 %1555 }
 0x68c   : > { %v1559_v0 = vmul.f32 %v1556_v20, %v2934_v5  ;;  %v1587_v5 = vmul.f32 %v1584_v63, %v2946_v59 }
 0x68e   : > { %v1561_v36 = vadd.f32 %v1559_v0, %v1547_v42 }
 0x690   : > { %v1302_v25 = vpop.permute.xlu1 %1301 }
 0x691   : > { %v1305_v3 = vmul.f32 %v1302_v25, %v2937_v24 }
 0x693   : > { %v1307_v11 = vadd.f32 %v1305_v3, %v1293_v60 }
 0x695   : > { %v1570_v14 = vpop.permute.xlu1 %1569 }
 0x696   : > { %v1573_v9 = vmul.f32 %v1570_v14, %v2937_v24 }
 0x698   : > { %v1575_v49 = vadd.f32 %v1573_v9, %v1561_v36 }
 0x69a   : > { %v1316_v8 = vpop.permute.xlu1 %1315  ;;  %v1589_v24 = vadd.f32 %v1587_v5, %v1575_v49 }
 0x69b   : > { %v1319_v54 = vmul.f32 %v1316_v8, %v2946_v59 }
 0x69d   : > { %v1321_v26 = vadd.f32 %v1319_v54, %v1307_v11 }
 0x69f   : > { %v1322_v39 = vpack.c.bf16 %v1321_v26, %v2780_v56  ;;  %v1580_v35 = vpop.permute.xlu1 %1579 }
 0x6a0   : > { %v1586_v45 = vmul.f32 %v1580_v35, %v2774_v46 }
 0x6a1   : > { %1324 = vst.msk [vmem:[#allocation3] sm:$0xff] %vm1323_vm9, %v1322_v39 }
 0x6a2   : > { %v1588_v7 = vadd.f32 %v1586_v45, %v2879_v16 }
 0x6a4   : > { %v1590_v15 = vpack.c.bf16 %v1589_v24, %v1588_v7 }
 0x6a6   : > { %1592 = vst.msk [vmem:[#allocation3] sm:$0xff] %vm1591_vm10, %v1590_v15 }
 0x6ad   : > { %v1593_v34 = vld [vmem:[#allocation3] sm:$0xff] }
 0x6ae   : > { %1838 = vmatmul.mubr.msk.bf16.vlgmr.msra.gmra.mrb[4].mxu0 %vm358_vm1, %v1593_v34 }
 0x781   : > { %v1647_v17 = vpop.f32.mrb[4].mxu0 }
 0x782   : > { %v1648_v4 = vadd.f32 %v2147_v29, %v1647_v17  ;;  %v1839_v56 = vpop.f32.mrb[5].mxu0 }
 0x783   : > { %v1650_v19 = vpop.f32.mrb[6].mxu0 }
 0x784   : > { %v1651_v37 = vadd.f32 %v2148_v21, %v1650_v19  ;;  %v1840_v59 = vpop.f32.mrb[7].mxu0  ;;  %v1654_v46 = vsel %vm358_vm1, %v1648_v4, 0.0 }
 0x785   : > { %1655 = vadd.xlane.f32.xlu1 %v1654_v46 }
 0x786   : > { %v1657_v32 = vsel %vm358_vm1, %v1651_v37, 0.0 }
 0x787   : > { %1658 = vadd.xlane.f32.xlu0 %v1657_v32 }
 0x812   : > { %v1656_v16 = vpop.xlane.xlu1 %1655 }
 0x813   : > { %v1661_v22 = vmul.f32 0.03125, %v1656_v16 }
 0x814   : > { %v1659_v28 = vpop.xlane.xlu0 %1658 }
 0x815   : > { %v1663_v10 = vsub.f32 %v1648_v4, %v1661_v22  ;;  %v1662_v43 = vmul.f32 0.03125, %v1659_v28 }
 0x817   : > { %v1664_v48 = vsub.f32 %v1651_v37, %v1662_v43  ;;  %v1665_v31 = vmul.f32 %v1663_v10, %v1663_v10 }
 0x819   : > { %v1667_v20 = vsel %vm358_vm1, %v1665_v31, 0.0  ;;  %v1666_v6 = vmul.f32 %v1664_v48, %v1664_v48 }
 0x81a   : > { %1668 = vadd.xlane.f32.xlu1 %v1667_v20 }
 0x81b   : > { %v1670_v50 = vsel %vm358_vm1, %v1666_v6, 0.0 }
 0x81c   : > { %1671 = vadd.xlane.f32.xlu0 %v1670_v50 }
 0x8a7   : > { %v1669_v53 = vpop.xlane.xlu1 %1668 }
 0x8a8   : > { %v1673_v55 = vmul.f32 0.03125, %v1669_v53 }
 0x8a9   : > { %v1672_v12 = vpop.xlane.xlu0 %1671 }
 0x8aa   : > { %v1675_v47 = vadd.f32 1e-06, %v1673_v55  ;;  %v1674_v51 = vmul.f32 0.03125, %v1672_v12 }
 0x8ac   : > { %2143 = vrsqrt.f32 %v1675_v47  ;;  %v1676_v23 = vadd.f32 1e-06, %v1674_v51 }
 0x8ae   : > { %2145 = vrsqrt.f32 %v1676_v23 }
 0x8b6   : > { %v2144_v44 = vpop.eup %2143 }
 0x8b7   : > { %v1679_v25 = vmul.f32 %v2144_v44, %v1663_v10 }
 0x8b8   : > { %v2146_v33 = vpop.eup %2145 }
 0x8b9   : > { %v1688_v1 = vmul.f32 %v1799_v61, %v1679_v25  ;;  %v1680_v41 = vmul.f32 %v2146_v33, %v1664_v48 }
 0x8bb   : > { %v1697_v38 = vadd.f32 %v1800_v58, %v1688_v1  ;;  %v1689_v62 = vmul.f32 %v1799_v61, %v1680_v41 }
 0x8bd   : > { %v1698_v57 = vadd.f32 %v1800_v58, %v1689_v62  ;;  %1699 = vst.msk [vmem:[%s325_s25] sm:$0xff] %vm358_vm1, %v1697_v38 }
 0x8bf   : > { %1700 = vst.msk [vmem:[%s325_s25 + $0x8] sm:$0xff] %vm358_vm1, %v1698_v57 }
 0x8c0   : > { %2162 = shalt.err (!%p2159_p3)
}
 0x8c1   : > { %s2163_s29 = scalar_lea.hbm %s3041_s14, 256  ;;  %s2167_s25 = scalar_lea.hbm %s3097_s9, 512 }
 0x8c2   : > { %p2164_p4 = scmp.ne.s32.totalorder %s3041_s14, %s2163_s29  ;;  %p2168_p9 = scmp.lt.u32.totalorder %s3041_s14, %s3097_s9 }
 0x8c3   : > { %p2169_p10 = scmp.lt.u32.totalorder %s2167_s25, %s2163_s29  ;;  %p2171_p12 = scmp.lt.u32.totalorder %s2163_s29, %s3041_s14 }
 0x8c4   : > { %p2165_p7 = pnand %p2164_p4, %p2375_p5 }
 0x8c5   : > { %p2170_p11 = por %p2169_p10, %p2168_p9 }
 0x8c6   : > { %p2166_p8 = pneg %p2165_p7 }
 0x8c7   : > { %p2172_p13 = por %p2171_p12, %p2170_p11 }
 0x8c9   : > { %p2173_p0 = pnand %p2172_p13, %p2166_p8 }
 0x8cb   : > { %2176 = shalt.err (!%p2173_p0)
}
 0x8cc   : > { %s2285_s16 = smov 128   ;;  %s2286_s17 = smov 8  }
 0x8cd   : > { %1841 = dma.vmem_to_hbm [thread:$0]  (%p2375_p5), %s3043_s26, 256, %s3041_s14, %s3047_s13, %s2285_s16, %s2285_s16, %s2286_s17  }
 0x8ce PF: > { %p1847_p1 = scmp.ge.s32.totalorder %s2211_s12, 2  ;;  %s1730_s21 = sand.u32 1, %s2199_s30  }
 0x8cf   : > { %s1731_s22 = scalar_lea.sflag [#allocation5], %s1730_s21 }
 0x8d0   : > { %p1844_p2 = pnand %p1847_p1, %p2379_p6 }
 0x8d2   : > { %2194 = dma.done.wait (!%p1844_p2), %s1731_s22, 256  }
 0x8d3   : > { %2196 = vsyncadd (!%p1844_p2), %s1731_s22, 4294967040  ;;  %p19_p3 = scmp.ge.s32.totalorder %s2362_s15, 4   ;;  %s3148_s30 = smov %s2203_s10 }
 0x8d4   : > { %s3149_s10 = smov %s2207_s11  ;;  %s3150_s11 = smov %s2373_s18 }
 0x8d5   : > { %s3151_s12 = smov %s2362_s15  ;;  %21 = sbr.rel (!%p19_p3) target bundleno = 3 (0x3), region = 91 }
 0x8dc   :  { %1736 = vsyncpa [#allocation5], 1 }
 0x8dd   :  { %1738 = vsyncpa [#allocation5 + $0x1], 1 }

</bundles_post_ra>
